<compile_context>
chip_gen: v6e
topology: v6e:2x2x1
jax: 0.10.0
libtpu: 0.0.40
codegen_flags: <defaults>
</compile_context>

<pallas_src>
import numpy as np
import jax
import jax.numpy as jnp
from jax import lax
from jax.experimental import pallas as pl
from jax.experimental.pallas import tpu as pltpu


_LANE = 128
_EDGE_TILE = 512        # fallback edge tile (multiple of 8 and 128)
_BN_EPS = 1e-5


def _round_up(v, m):
    return (v + m - 1) // m * m


# ---------------------------------------------------------------------------
# Fused kernel builder: full GNN stack (all layers) in one pallas_call.
#   grid = (num_layer, num_edge_tiles)   -- both "arbitrary" (serial carries)
# The real node count is baked in for masked BatchNorm statistics.
# ---------------------------------------------------------------------------
def _make_gin_stack_kernel(n_real, n_pad):
    inv_n = 1.0 / float(n_real)

    def kernel(
        x_ref,        # [Np, Dp] f32   initial node features (row/lane padded)
        src_oh_ref,   # [TE, Np] bf16  one-hot of edge sources      (edge tile)
        dst_t_ref,    # [Np, TE] bf16  one-hot of edge dests, pre-transposed
        attr_oh_ref,  # [TE, Tp] bf16  packed bond-attr one-hot     (edge tile)
        ew_ref,       # [TE, 1]  f32   edge weights                 (edge tile)
        eps_ref,      # [L]      f32   GIN eps parameters, SMEM
        btab_ref,     # [Tp, Dp] bf16  stacked bond-encoder tables  (per layer)
        w1_ref,       # [Dp, Hp] bf16  mlp Linear1 weight
        b1_ref,       # [1, Hp]  f32
        g1_ref,       # [1, Hp]  f32   mlp BatchNorm gamma
        be1_ref,      # [1, Hp]  f32   mlp BatchNorm beta
        w2_ref,       # [Hp, Dp] bf16  mlp Linear2 weight
        b2_ref,       # [1, Dp]  f32
        gn_ref,       # [1, Dp]  f32   block BatchNorm gamma
        bn_ref,       # [1, Dp]  f32   block BatchNorm beta
        out_ref,      # [Np, Dp] f32
        h_ref,        # scratch [Np, Dp] f32  : node features carried across layers
        agg_ref,      # scratch [Np, Dp] f32  : per-layer aggregation accumulator
        hb_ref,       # scratch [Np, Dp] bf16 : per-layer cast of h (hoisted)
    ):
        layer = pl.program_id(0)
        tile = pl.program_id(1)
        n_layers = pl.num_programs(0)
        n_tiles = pl.num_programs(1)

        # Initialize the resident node-feature scratch from the input (once).
        @pl.when(jnp.logical_and(layer == 0, tile == 0))
        def _():
            h_ref[...] = x_ref[...]

        # Start of every layer: zero aggregator, hoist the h -> bf16 cast.
        @pl.when(tile == 0)
        def _():
            agg_ref[...] = jnp.zeros_like(agg_ref)
            hb_ref[...] = h_ref[...].astype(jnp.bfloat16)

        # ---- message passing over this edge tile (MXU gather + scatter) ----
        x_j = jnp.dot(src_oh_ref[...], hb_ref[...],
                      preferred_element_type=jnp.float32)          # [TE, Dp]
        ee = jnp.dot(attr_oh_ref[...], btab_ref[...],
                     preferred_element_type=jnp.float32)           # [TE, Dp]
        msg = jnp.maximum(x_j + ee, 0.0) * ew_ref[...]             # f32 VPU
        # scatter-add via pre-transposed one-hot: plain matmul, no transpose.
        agg_ref[...] += jnp.dot(dst_t_ref[...], msg.astype(jnp.bfloat16),
                                preferred_element_type=jnp.float32)

        # ---- after the last edge tile: GIN combine + MLP + block BN --------
        @pl.when(tile == n_tiles - 1)
        def _():
            row_mask = (lax.broadcasted_iota(jnp.int32, (n_pad, 1), 0)
                        < n_real).astype(jnp.float32)

            h0 = (1.0 + eps_ref[layer]) * h_ref[...] + agg_ref[...]

            # MLP: Linear -> BatchNorm1d (masked batch stats) -> ReLU -> Linear
            h1 = jnp.dot(h0.astype(jnp.bfloat16), w1_ref[...],
                         preferred_element_type=jnp.float32) + b1_ref[...]
            mu1 = jnp.sum(h1 * row_mask, axis=0, keepdims=True) * inv_n
            var1 = jnp.sum(jnp.square(h1 - mu1) * row_mask, axis=0,
                           keepdims=True) * inv_n                  # biased (torch BN)
            h1 = (h1 - mu1) * lax.rsqrt(var1 + _BN_EPS) * g1_ref[...] + be1_ref[...]
            h1 = jnp.maximum(h1, 0.0)
            h2 = jnp.dot(h1.astype(jnp.bfloat16), w2_ref[...],
                         preferred_element_type=jnp.float32) + b2_ref[...]

            # GNNBlock BatchNorm1d (masked batch statistics)
            mu2 = jnp.sum(h2 * row_mask, axis=0, keepdims=True) * inv_n
            var2 = jnp.sum(jnp.square(h2 - mu2) * row_mask, axis=0,
                           keepdims=True) * inv_n
            h2 = (h2 - mu2) * lax.rsqrt(var2 + _BN_EPS) * gn_ref[...] + bn_ref[...]
            h2 = h2 * row_mask        # keep padded node rows exactly zero

            # ReLU on every layer except the last; dropout(p=0) is identity.
            @pl.when(layer != n_layers - 1)
            def _():
                h_ref[...] = jnp.maximum(h2, 0.0)

            @pl.when(layer == n_layers - 1)
            def _():
                h_ref[...] = h2
                out_ref[...] = h2

    return kernel


# ---------------------------------------------------------------------------
# Glue reproducing AtomBondGraph.forward semantics (JK='last').
# ---------------------------------------------------------------------------
def atom_bond_graph_forward(batch, x, params, num_layer, use_super_node=True,
                            JK="last"):
    if JK != "last":
        raise ValueError("only JK='last' is supported here")

    x_mask = np.asarray(batch["x_mask"], dtype=bool)     # concrete mask
    edge_index = batch["edge_index"]
    edge_attr = batch["edge_attr"]
    edge_weight = batch["edge_weight"]

    B = x.shape[0]
    D = x.shape[-1]
    xs = x[:, int(use_super_node):, :].reshape(-1, D)
    node_idx = np.where(x_mask)[0]
    xm = xs[node_idx]                                    # [N, D]
    N = int(xm.shape[0])

    Dp = _round_up(D, _LANE)                             # lane-dense emb dim
    Hp = _round_up(2 * D, _LANE)                         # lane-dense hidden dim
    Np = _round_up(N, _LANE)                             # lane-dense node axis

    # --- add self loops (GINConv.forward) ---
    self_ids = jnp.arange(N, dtype=jnp.int32)
    src = jnp.concatenate([edge_index[0].astype(jnp.int32), self_ids])
    dst = jnp.concatenate([edge_index[1].astype(jnp.int32), self_ids])
    self_loop_attr = jnp.zeros((N, 3), dtype=edge_attr.dtype)
    self_loop_attr = self_loop_attr.at[:, 0].set(5).at[:, 1].set(7)
    ea = jnp.concatenate([edge_attr, self_loop_attr], axis=0)        # [E, 3]
    ew = jnp.concatenate([edge_weight.astype(jnp.float32),
                          jnp.ones((N,), jnp.float32)])              # [E]
    E = int(src.shape[0])

    # --- bond-encoder table packing (layout shared across layers) ---
    table_sizes = [int(t.shape[0]) for t in params[0][0]]
    offs = np.concatenate([[0], np.cumsum(table_sizes)[:-1]]).astype(np.int32)
    Tp = _round_up(int(sum(table_sizes)), _LANE)

    # --- per-generation VMEM budget & edge-tile selection ---
    try:
        phys_vmem = int(getattr(pltpu.get_tpu_info(), "vmem_capacity_bytes"))
    except Exception:
        phys_vmem = 64 * 1024 * 1024                     # conservative (v7x)
    budget = int(phys_vmem * 0.70)

    def vmem_need(te):
        scratch = Np * Dp * (4 + 4 + 2)                              # h, agg, h_bf16
        edge_tile = te * Np * 2 + Np * te * 2 + te * Tp * 2 + te * 4  # src, dstT, attr, ew
        per_layer = (Dp * Hp + Hp * Dp + Tp * Dp) * 2 + (3 * Hp + 3 * Dp) * 4
        io = 2 * Np * Dp * 4                                         # x block + out block
        return scratch + io + 2 * (edge_tile + per_layer)            # double-buffered

    Ep_full = _round_up(E, _LANE)
    if vmem_need(Ep_full) <= budget:
        # Whole edge set stays VMEM-resident; fetched from HBM exactly once
        # (constant block index across all layers).
        Ep, TE = Ep_full, Ep_full
    else:
        # TODO(synk): for graphs too large to keep resident, a pl.ANY +
        # one-time manual-DMA resident copy (or int8/fp8 one-hots) would still
        # avoid re-streaming per layer; here we fall back to edge tiling.
        TE = _EDGE_TILE
        Ep = _round_up(E, TE)
    n_tiles = Ep // TE

    pad_e = Ep - E
    # padded edges: index -1 -> all-zero one-hot row/col, weight 0 -> no effect
    src_p = jnp.concatenate([src, -jnp.ones((pad_e,), jnp.int32)])
    dst_p = jnp.concatenate([dst, -jnp.ones((pad_e,), jnp.int32)])
    ew_p = jnp.concatenate([ew, jnp.zeros((pad_e,), jnp.float32)])
    ea_p = jnp.concatenate([ea, jnp.zeros((pad_e, 3), ea.dtype)], axis=0)

    # exact 0/1 one-hots (bf16); edge weights applied in-kernel as [TE,1] f32
    src_oh = jax.nn.one_hot(src_p, Np, dtype=jnp.bfloat16)           # [Ep, Np]
    dst_t = jax.nn.one_hot(dst_p, Np, dtype=jnp.bfloat16).T          # [Np, Ep] pre-transposed
    col0 = ea_p[:, 0].astype(jnp.int32) + int(offs[0])
    col1 = ea_p[:, 1].astype(jnp.int32) + int(offs[1])
    col2 = ea_p[:, 2].astype(jnp.int32) + int(offs[2])
    attr_oh = (jax.nn.one_hot(col0, Tp, dtype=jnp.float32)
               + jax.nn.one_hot(col1, Tp, dtype=jnp.float32)
               + jax.nn.one_hot(col2, Tp, dtype=jnp.float32)).astype(jnp.bfloat16)
    ew_col = ew_p[:, None]                                           # [Ep, 1] f32

    def pad2(a, r, c):
        a = jnp.asarray(a, jnp.float32)
        return jnp.pad(a, ((0, r - a.shape[0]), (0, c - a.shape[1])))

    # --- per-layer stacked parameters ---
    eps_l, btab_l = [], []
    w1_l, b1_l, g1_l, be1_l = [], [], [], []
    w2_l, b2_l, gn_l, bn_l = [], [], [], []
    for tables, (eps, w1, b1, g1, be1, w2, b2, gn, bn) in params:
        btab = jnp.concatenate([jnp.asarray(t, jnp.float32) for t in tables], axis=0)
        btab_l.append(pad2(btab, Tp, Dp).astype(jnp.bfloat16))
        eps_l.append(jnp.reshape(jnp.asarray(eps, jnp.float32), (1,)))
        w1_l.append(pad2(w1, Dp, Hp).astype(jnp.bfloat16))
        b1_l.append(pad2(b1, 1, Hp))
        g1_l.append(pad2(g1, 1, Hp))
        be1_l.append(pad2(be1, 1, Hp))
        w2_l.append(pad2(w2, Hp, Dp).astype(jnp.bfloat16))
        b2_l.append(pad2(b2, 1, Dp))
        gn_l.append(pad2(gn, 1, Dp))
        bn_l.append(pad2(bn, 1, Dp))

    eps_all = jnp.concatenate(eps_l)                     # [L]  (SMEM)
    btab_all = jnp.stack(btab_l)                         # [L, Tp, Dp] bf16
    w1_all = jnp.stack(w1_l);  b1_all = jnp.stack(b1_l)
    g1_all = jnp.stack(g1_l);  be1_all = jnp.stack(be1_l)
    w2_all = jnp.stack(w2_l);  b2_all = jnp.stack(b2_l)
    gn_all = jnp.stack(gn_l);  bn_all = jnp.stack(bn_l)
    xm_p = pad2(xm, Np, Dp)                              # [Np, Dp] f32

    node_spec = pl.BlockSpec((Np, Dp), lambda l, t: (0, 0))
    src_spec = pl.BlockSpec((TE, Np), lambda l, t: (t, 0))
    dst_spec = pl.BlockSpec((Np, TE), lambda l, t: (0, t))
    attr_spec = pl.BlockSpec((TE, Tp), lambda l, t: (t, 0))
    ew_spec = pl.BlockSpec((TE, 1), lambda l, t: (t, 0))

    def per_layer(shape2):
        return pl.BlockSpec((None,) + shape2, lambda l, t: (l, 0, 0))

    kernel = _make_gin_stack_kernel(N, Np)

    out_p = pl.pallas_call(
        kernel,
        grid=(num_layer, n_tiles),
        in_specs=[
            node_spec,                                           # x
            src_spec,                                            # src one-hot (bf16)
            dst_spec,                                            # dst one-hot^T (bf16)
            attr_spec,                                           # packed attr one-hot
            ew_spec,                                             # edge weights
            pl.BlockSpec(memory_space=pltpu.MemorySpace.SMEM),   # eps (scalar path)
            per_layer((Tp, Dp)),                                 # bond-encoder tables
            per_layer((Dp, Hp)),                                 # w1
            per_layer((1, Hp)),                                  # b1
            per_layer((1, Hp)),                                  # g1
            per_layer((1, Hp)),                                  # be1
            per_layer((Hp, Dp)),                                 # w2
            per_layer((1, Dp)),                                  # b2
            per_layer((1, Dp)),                                  # gn
            per_layer((1, Dp)),                                  # bn
        ],
        out_specs=node_spec,
        out_shape=jax.ShapeDtypeStruct((Np, Dp), jnp.float32),
        scratch_shapes=[pltpu.VMEM((Np, Dp), jnp.float32),       # h (carried)
                        pltpu.VMEM((Np, Dp), jnp.float32),       # agg accumulator
                        pltpu.VMEM((Np, Dp), jnp.bfloat16)],     # h bf16 (per layer)
        compiler_params=pltpu.CompilerParams(
            dimension_semantics=("arbitrary", "arbitrary"),
            vmem_limit_bytes=budget),
    )(xm_p, src_oh, dst_t, attr_oh, ew_col, eps_all, btab_all,
      w1_all, b1_all, g1_all, be1_all, w2_all, b2_all, gn_all, bn_all)

    node_representation = out_p[:N, :D]

    # --- scatter back into the padded batch tensor and add residual ---
    x_zeros = jnp.zeros(xs.shape, dtype=jnp.float32)
    x_zeros = x_zeros.at[node_idx].set(node_representation)
    res = x.at[:, int(use_super_node):, :].add(x_zeros.reshape(B, -1, D))
    return res


# ---------------------------------------------------------------------------
# Pure-JAX reference (segment_sum message passing), for a sanity check.
# ---------------------------------------------------------------------------
def _reference_forward(batch, x, params, num_layer, use_super_node=True):
    x_mask = np.asarray(batch["x_mask"], dtype=bool)
    B, D = x.shape[0], x.shape[-1]
    xs = x[:, int(use_super_node):, :].reshape(-1, D)
    idx = np.where(x_mask)[0]
    h = xs[idx]
    N = h.shape[0]
    self_ids = jnp.arange(N, dtype=jnp.int32)
    src = jnp.concatenate([batch["edge_index"][0].astype(jnp.int32), self_ids])
    dst = jnp.concatenate([batch["edge_index"][1].astype(jnp.int32), self_ids])
    sl = jnp.zeros((N, 3), batch["edge_attr"].dtype).at[:, 0].set(5).at[:, 1].set(7)
    ea = jnp.concatenate([batch["edge_attr"], sl], axis=0)
    ew = jnp.concatenate([batch["edge_weight"],
                          jnp.ones((N,), batch["edge_weight"].dtype)])
    for i in range(num_layer):
        tables, (eps, w1, b1, g1, be1, w2, b2, gn, bn) = params[i]
        ee = tables[0][ea[:, 0]] + tables[1][ea[:, 1]] + tables[2][ea[:, 2]]
        msg = jnp.maximum(h[src] + ee, 0.0) * ew[:, None]
        agg = jax.ops.segment_sum(msg, dst, num_segments=N)
        h0 = (1.0 + eps[0, 0]) * h + agg
        h1 = h0 @ w1 + b1
        mu1 = h1.mean(0, keepdims=True)
        v1 = jnp.square(h1 - mu1).mean(0, keepdims=True)
        h1 = jnp.maximum((h1 - mu1) * lax.rsqrt(v1 + _BN_EPS) * g1 + be1, 0.0)
        h2 = h1 @ w2 + b2
        mu2 = h2.mean(0, keepdims=True)
        v2 = jnp.square(h2 - mu2).mean(0, keepdims=True)
        h2 = (h2 - mu2) * lax.rsqrt(v2 + _BN_EPS) * gn + bn
        if i != num_layer - 1:
            h2 = jnp.maximum(h2, 0.0)
        h = h2
    x_zeros = jnp.zeros(xs.shape, jnp.float32).at[idx].set(h)
    return x.at[:, int(use_super_node):, :].add(x_zeros.reshape(B, -1, D))


# ---------------------------------------------------------------------------
# Deterministic parameters / inputs and smoke test.
# ---------------------------------------------------------------------------
def make_params(key, num_layer, D):
    params = []
    for _ in range(num_layer):
        keys = jax.random.split(key, 8)
        key = keys[0]
        tables = [0.1 * jax.random.normal(keys[1 + t], (8, D), jnp.float32)
                  for t in range(3)]                          # BondEncoder tables
        eps = jnp.zeros((1, 1), jnp.float32)                  # GIN eps init = 0
        w1 = 0.1 * jax.random.normal(keys[4], (D, 2 * D), jnp.float32)
        b1 = 0.1 * jax.random.normal(keys[5], (1, 2 * D), jnp.float32)
        g1 = jnp.ones((1, 2 * D), jnp.float32)
        be1 = jnp.zeros((1, 2 * D), jnp.float32)
        w2 = 0.1 * jax.random.normal(keys[6], (2 * D, D), jnp.float32)
        b2 = 0.1 * jax.random.normal(keys[7], (1, D), jnp.float32)
        gn = jnp.ones((1, D), jnp.float32)
        bn = jnp.zeros((1, D), jnp.float32)
        params.append((tables, (eps, w1, b1, g1, be1, w2, b2, gn, bn)))
    return params


if __name__ == "__main__":
    key = jax.random.PRNGKey(0)

    B, Nper, D = 2, 8, 32          # x: [B, Nper + super_node, D]
    num_layer = 2
    E0 = 24                        # real edges (before self loops)

    k_x, k_src, k_dst, k_a0, k_a1, k_a2, k_w, k_p = jax.random.split(key, 8)

    x = jax.random.normal(k_x, (B, Nper + 1, D), jnp.float32)

    # Mask selects the first 4 nodes of each graph -> N = 8 masked nodes.
    x_mask = np.zeros(B * Nper, dtype=bool)
    x_mask[0:4] = True
    x_mask[Nper:Nper + 4] = True
    N = int(x_mask.sum())

    edge_src = jax.random.randint(k_src, (E0,), 0, N, jnp.int32)
    edge_dst = jax.random.randint(k_dst, (E0,), 0, N, jnp.int32)
    edge_index = jnp.stack([edge_src, edge_dst], axis=0)
    edge_attr = jnp.stack([
        jax.random.randint(k_a0, (E0,), 0, 5, jnp.int32),
        jax.random.randint(k_a1, (E0,), 0, 6, jnp.int32),
        jax.random.randint(k_a2, (E0,), 0, 2, jnp.int32),
    ], axis=1)
    edge_weight = jax.random.uniform(k_w, (E0,), jnp.float32, 0.5, 1.5)

    batch = {
        "x_mask": x_mask,
        "edge_index": edge_index,
        "edge_attr": edge_attr,
        "edge_weight": edge_weight,
    }
    params = make_params(k_p, num_layer, D)

    out = atom_bond_graph_forward(batch, x, params, num_layer,
                                  use_super_node=True, JK="last")
    out = jax.block_until_ready(out)
    assert out.shape == x.shape and out.dtype == jnp.float32
    assert bool(jnp.isfinite(out).all())

    # Sanity check vs. pure-JAX f32 reference (bf16 message/MLP tolerance).
    ref = _reference_forward(batch, x, params, num_layer, use_super_node=True)
    max_err = float(jnp.max(jnp.abs(out - ref)))
    assert max_err < 0.5, f"kernel/reference mismatch: {max_err}"

    print("KERNEL_OK")
</pallas_src>

<mosaic_0001>
module attributes {stable_mosaic.version = 11 : i64} {
  func.func @kernel(%arg0: i32, %arg1: i32, %arg2: memref<128x128xf32, #tpu.memory_space<vmem>>, %arg3: memref<128x128xbf16, #tpu.memory_space<vmem>>, %arg4: memref<128x128xbf16, #tpu.memory_space<vmem>>, %arg5: memref<128x128xbf16, #tpu.memory_space<vmem>>, %arg6: memref<128x1xf32, #tpu.memory_space<vmem>>, %arg7: memref<2xf32, #tpu.memory_space<smem>>, %arg8: memref<1x128x128xbf16, #tpu.memory_space<vmem>>, %arg9: memref<1x128x128xbf16, #tpu.memory_space<vmem>>, %arg10: memref<1x1x128xf32, #tpu.memory_space<vmem>>, %arg11: memref<1x1x128xf32, #tpu.memory_space<vmem>>, %arg12: memref<1x1x128xf32, #tpu.memory_space<vmem>>, %arg13: memref<1x128x128xbf16, #tpu.memory_space<vmem>>, %arg14: memref<1x1x128xf32, #tpu.memory_space<vmem>>, %arg15: memref<1x1x128xf32, #tpu.memory_space<vmem>>, %arg16: memref<1x1x128xf32, #tpu.memory_space<vmem>>, %arg17: memref<128x128xf32, #tpu.memory_space<vmem>>, %arg18: memref<128x128xf32, #tpu.memory_space<vmem>>, %arg19: memref<128x128xf32, #tpu.memory_space<vmem>>, %arg20: memref<128x128xbf16, #tpu.memory_space<vmem>>) attributes {dimension_semantics = [#tpu.dimension_semantics<arbitrary>, #tpu.dimension_semantics<arbitrary>], iteration_bounds = array<i64: 2, 1>, scalar_prefetch = 0 : i64, scratch_operands = 3 : i64, tpu.core_type = #tpu.core_type<tc>, window_params = [{pipeline_mode = #tpu.pipeline_mode<synchronous>, transform_indices = @transform_0, window_bounds = array<i64: 128, 128>}, {transform_indices = @transform_1, window_bounds = array<i64: 128, 128>}, {transform_indices = @transform_2, window_bounds = array<i64: 128, 128>}, {transform_indices = @transform_3, window_bounds = array<i64: 128, 128>}, {transform_indices = @transform_4, window_bounds = array<i64: 128, 1>}, {transform_indices = @transform_5, window_bounds = array<i64: 2>}, {transform_indices = @transform_6, window_bounds = array<i64: 1, 128, 128>}, {transform_indices = @transform_7, window_bounds = array<i64: 1, 128, 128>}, {transform_indices = @transform_8, window_bounds = array<i64: 1, 1, 128>}, {transform_indices = @transform_9, window_bounds = array<i64: 1, 1, 128>}, {transform_indices = @transform_10, window_bounds = array<i64: 1, 1, 128>}, {transform_indices = @transform_11, window_bounds = array<i64: 1, 128, 128>}, {transform_indices = @transform_12, window_bounds = array<i64: 1, 1, 128>}, {transform_indices = @transform_13, window_bounds = array<i64: 1, 1, 128>}, {transform_indices = @transform_14, window_bounds = array<i64: 1, 1, 128>}, {pipeline_mode = #tpu.pipeline_mode<synchronous>, transform_indices = @transform_15, window_bounds = array<i64: 128, 128>}]} {
    %c0_i32 = arith.constant 0 : i32
    %0 = arith.cmpi eq, %arg0, %c0_i32 : i32
    %c0_i32_0 = arith.constant 0 : i32
    %1 = arith.cmpi eq, %arg1, %c0_i32_0 : i32
    %2 = arith.andi %0, %1 : i1
    %3 = arith.extui %2 : i1 to i32
    %c0_i32_1 = arith.constant 0 : i32
    %4 = arith.cmpi ne, %3, %c0_i32_1 : i32
    scf.if %4 {
      %c0_25 = arith.constant 0 : index
      %c0_26 = arith.constant 0 : index
      %30 = vector.load %arg2[%c0_25, %c0_26] : memref<128x128xf32, #tpu.memory_space<vmem>>, vector<128x128xf32>
      %c0_27 = arith.constant 0 : index
      %c0_28 = arith.constant 0 : index
      %31 = vector.load %arg18[%c0_27, %c0_28] : memref<128x128xf32, #tpu.memory_space<vmem>>, vector<128x128xf32>
      tpu.vector_store %arg18[%c0_27, %c0_28], %30 {strides = array<i32>} : memref<128x128xf32, #tpu.memory_space<vmem>>, vector<128x128xf32>,
    } else {
    }
    %c0_i32_2 = arith.constant 0 : i32
    %5 = arith.cmpi eq, %arg1, %c0_i32_2 : i32
    %6 = arith.extui %5 : i1 to i32
    %c0_i32_3 = arith.constant 0 : i32
    %7 = arith.cmpi ne, %6, %c0_i32_3 : i32
    scf.if %7 {
      %cst_25 = arith.constant 0.000000e+00 : f32
      %30 = vector.broadcast %cst_25 : f32 to vector<128x128xf32>
      %c0_26 = arith.constant 0 : index
      %c0_27 = arith.constant 0 : index
      %31 = vector.load %arg19[%c0_26, %c0_27] : memref<128x128xf32, #tpu.memory_space<vmem>>, vector<128x128xf32>
      tpu.vector_store %arg19[%c0_26, %c0_27], %30 {strides = array<i32>} : memref<128x128xf32, #tpu.memory_space<vmem>>, vector<128x128xf32>,
      %c0_28 = arith.constant 0 : index
      %c0_29 = arith.constant 0 : index
      %32 = vector.load %arg18[%c0_28, %c0_29] : memref<128x128xf32, #tpu.memory_space<vmem>>, vector<128x128xf32>
      %33 = arith.truncf %32 : vector<128x128xf32> to vector<128x128xbf16>
      %c0_30 = arith.constant 0 : index
      %c0_31 = arith.constant 0 : index
      %34 = vector.load %arg20[%c0_30, %c0_31] : memref<128x128xbf16, #tpu.memory_space<vmem>>, vector<128x128xbf16>
      tpu.vector_store %arg20[%c0_30, %c0_31], %33 {strides = array<i32>} : memref<128x128xbf16, #tpu.memory_space<vmem>>, vector<128x128xbf16>,
    } else {
    }
    %c0 = arith.constant 0 : index
    %c0_4 = arith.constant 0 : index
    %8 = vector.load %arg3[%c0, %c0_4] : memref<128x128xbf16, #tpu.memory_space<vmem>>, vector<128x128xbf16>
    %c0_5 = arith.constant 0 : index
    %c0_6 = arith.constant 0 : index
    %9 = vector.load %arg20[%c0_5, %c0_6] : memref<128x128xbf16, #tpu.memory_space<vmem>>, vector<128x128xbf16>
    %cst = arith.constant dense<0.000000e+00> : vector<128x128xf32>
    %10 = tpu.matmul %8, %9, %cst {dimension_numbers = #tpu.dot_dimension_numbers<[1], [0], [0], [1], [0, 0, 1, 1], [], []>} : vector<128x128xbf16>, vector<128x128xbf16>, vector<128x128xf32> -> vector<128x128xf32>
    %c0_7 = arith.constant 0 : index
    %c0_8 = arith.constant 0 : index
    %11 = vector.load %arg5[%c0_7, %c0_8] : memref<128x128xbf16, #tpu.memory_space<vmem>>, vector<128x128xbf16>
    %c0_9 = arith.constant 0 : index
    %c0_10 = arith.constant 0 : index
    %c0_11 = arith.constant 0 : index
    %12 = vector.load %arg8[%c0_9, %c0_10, %c0_11] : memref<1x128x128xbf16, #tpu.memory_space<vmem>>, vector<1x128x128xbf16>
    %13 = vector.shape_cast %12 : vector<1x128x128xbf16> to vector<128x128xbf16>
    %cst_12 = arith.constant dense<0.000000e+00> : vector<128x128xf32>
    %14 = tpu.matmul %11, %13, %cst_12 {dimension_numbers = #tpu.dot_dimension_numbers<[1], [0], [0], [1], [0, 0, 1, 1], [], []>} : vector<128x128xbf16>, vector<128x128xbf16>, vector<128x128xf32> -> vector<128x128xf32>
    %15 = arith.addf %10, %14 : vector<128x128xf32>
    %cst_13 = arith.constant 0.000000e+00 : f32
    %16 = vector.broadcast %cst_13 : f32 to vector<128x128xf32>
    %17 = arith.maximumf %15, %16 : vector<128x128xf32>
    %c0_14 = arith.constant 0 : index
    %c0_15 = arith.constant 0 : index
    %18 = vector.load %arg6[%c0_14, %c0_15] : memref<128x1xf32, #tpu.memory_space<vmem>>, vector<128x1xf32>
    %19 = vector.broadcast %18 : vector<128x1xf32> to vector<128x128xf32>
    %20 = arith.mulf %17, %19 : vector<128x128xf32>
    %c0_16 = arith.constant 0 : index
    %c0_17 = arith.constant 0 : index
    %21 = vector.load %arg19[%c0_16, %c0_17] : memref<128x128xf32, #tpu.memory_space<vmem>>, vector<128x128xf32>
    %c0_18 = arith.constant 0 : index
    %c0_19 = arith.constant 0 : index
    %22 = vector.load %arg4[%c0_18, %c0_19] : memref<128x128xbf16, #tpu.memory_space<vmem>>, vector<128x128xbf16>
    %23 = arith.truncf %20 : vector<128x128xf32> to vector<128x128xbf16>
    %cst_20 = arith.constant dense<0.000000e+00> : vector<128x128xf32>
    %24 = tpu.matmul %22, %23, %cst_20 {dimension_numbers = #tpu.dot_dimension_numbers<[1], [0], [0], [1], [0, 0, 1, 1], [], []>} : vector<128x128xbf16>, vector<128x128xbf16>, vector<128x128xf32> -> vector<128x128xf32>
    %25 = arith.addf %21, %24 : vector<128x128xf32>
    %c0_21 = arith.constant 0 : index
    %c0_22 = arith.constant 0 : index
    %26 = vector.load %arg19[%c0_21, %c0_22] : memref<128x128xf32, #tpu.memory_space<vmem>>, vector<128x128xf32>
    tpu.vector_store %arg19[%c0_21, %c0_22], %25 {strides = array<i32>} : memref<128x128xf32, #tpu.memory_space<vmem>>, vector<128x128xf32>,
    %c0_i32_23 = arith.constant 0 : i32
    %27 = arith.cmpi eq, %arg1, %c0_i32_23 : i32
    %28 = arith.extui %27 : i1 to i32
    %c0_i32_24 = arith.constant 0 : i32
    %29 = arith.cmpi ne, %28, %c0_i32_24 : i32
    scf.if %29 {
      %30 = tpu.iota {dimensions = array<i32: 0>} : vector<128x1xi32>
      %c8_i32 = arith.constant 8 : i32
      %31 = vector.broadcast %c8_i32 : i32 to vector<128x1xi32>
      %32 = arith.cmpi slt, %30, %31 : vector<128x1xi32>
      %33 = arith.extui %32 : vector<128x1xi1> to vector<128x1xi32>
      %34 = arith.sitofp %33 : vector<128x1xi32> to vector<128x1xf32>
      %35 = arith.index_cast %arg0 : i32 to index
      %36 = memref.load %arg7[%35] : memref<2xf32, #tpu.memory_space<smem>>
      %cst_25 = arith.constant 1.000000e+00 : f32
      %37 = arith.addf %cst_25, %36 : f32
      %c0_26 = arith.constant 0 : index
      %c0_27 = arith.constant 0 : index
      %38 = vector.load %arg18[%c0_26, %c0_27] : memref<128x128xf32, #tpu.memory_space<vmem>>, vector<128x128xf32>
      %39 = vector.broadcast %37 : f32 to vector<128x128xf32>
      %40 = arith.mulf %39, %38 : vector<128x128xf32>
      %c0_28 = arith.constant 0 : index
      %c0_29 = arith.constant 0 : index
      %41 = vector.load %arg19[%c0_28, %c0_29] : memref<128x128xf32, #tpu.memory_space<vmem>>, vector<128x128xf32>
      %42 = arith.addf %40, %41 : vector<128x128xf32>
      %43 = arith.truncf %42 : vector<128x128xf32> to vector<128x128xbf16>
      %c0_30 = arith.constant 0 : index
      %c0_31 = arith.constant 0 : index
      %c0_32 = arith.constant 0 : index
      %44 = vector.load %arg9[%c0_30, %c0_31, %c0_32] : memref<1x128x128xbf16, #tpu.memory_space<vmem>>, vector<1x128x128xbf16>
      %45 = vector.shape_cast %44 : vector<1x128x128xbf16> to vector<128x128xbf16>
      %cst_33 = arith.constant dense<0.000000e+00> : vector<128x128xf32>
      %46 = tpu.matmul %43, %45, %cst_33 {dimension_numbers = #tpu.dot_dimension_numbers<[1], [0], [0], [1], [0, 0, 1, 1], [], []>} : vector<128x128xbf16>, vector<128x128xbf16>, vector<128x128xf32> -> vector<128x128xf32>
      %c0_34 = arith.constant 0 : index
      %c0_35 = arith.constant 0 : index
      %c0_36 = arith.constant 0 : index
      %47 = vector.load %arg10[%c0_34, %c0_35, %c0_36] : memref<1x1x128xf32, #tpu.memory_space<vmem>>, vector<1x1x128xf32>
      %48 = vector.shape_cast %47 : vector<1x1x128xf32> to vector<1x128xf32>
      %49 = vector.broadcast %48 : vector<1x128xf32> to vector<128x128xf32>
      %50 = arith.addf %46, %49 : vector<128x128xf32>
      %51 = vector.broadcast %34 : vector<128x1xf32> to vector<128x128xf32>
      %52 = arith.mulf %50, %51 : vector<128x128xf32>
      %cst_37 = arith.constant dense<0.000000e+00> : vector<128xf32>
      %53 = vector.multi_reduction <add>, %52, %cst_37 [0] : vector<128x128xf32> to vector<128xf32>
      %54 = vector.shape_cast %53 : vector<128xf32> to vector<1x128xf32>
      %cst_38 = arith.constant 1.250000e-01 : f32
      %55 = vector.broadcast %cst_38 : f32 to vector<1x128xf32>
      %56 = arith.mulf %54, %55 : vector<1x128xf32>
      %57 = vector.broadcast %56 : vector<1x128xf32> to vector<128x128xf32>
      %58 = arith.subf %50, %57 : vector<128x128xf32>
      %59 = arith.mulf %58, %58 : vector<128x128xf32>
      %60 = vector.broadcast %34 : vector<128x1xf32> to vector<128x128xf32>
      %61 = arith.mulf %59, %60 : vector<128x128xf32>
      %cst_39 = arith.constant dense<0.000000e+00> : vector<128xf32>
      %62 = vector.multi_reduction <add>, %61, %cst_39 [0] : vector<128x128xf32> to vector<128xf32>
      %63 = vector.shape_cast %62 : vector<128xf32> to vector<1x128xf32>
      %cst_40 = arith.constant 1.250000e-01 : f32
      %64 = vector.broadcast %cst_40 : f32 to vector<1x128xf32>
      %65 = arith.mulf %63, %64 : vector<1x128xf32>
      %66 = vector.broadcast %56 : vector<1x128xf32> to vector<128x128xf32>
      %67 = arith.subf %50, %66 : vector<128x128xf32>
      %cst_41 = arith.constant 9.99999974E-6 : f32
      %68 = vector.broadcast %cst_41 : f32 to vector<1x128xf32>
      %69 = arith.addf %65, %68 : vector<1x128xf32>
      %70 = math.rsqrt %69 : vector<1x128xf32>
      %71 = vector.broadcast %70 : vector<1x128xf32> to vector<128x128xf32>
      %72 = arith.mulf %67, %71 : vector<128x128xf32>
      %c0_42 = arith.constant 0 : index
      %c0_43 = arith.constant 0 : index
      %c0_44 = arith.constant 0 : index
      %73 = vector.load %arg11[%c0_42, %c0_43, %c0_44] : memref<1x1x128xf32, #tpu.memory_space<vmem>>, vector<1x1x128xf32>
      %74 = vector.shape_cast %73 : vector<1x1x128xf32> to vector<1x128xf32>
      %75 = vector.broadcast %74 : vector<1x128xf32> to vector<128x128xf32>
      %76 = arith.mulf %72, %75 : vector<128x128xf32>
      %c0_45 = arith.constant 0 : index
      %c0_46 = arith.constant 0 : index
      %c0_47 = arith.constant 0 : index
      %77 = vector.load %arg12[%c0_45, %c0_46, %c0_47] : memref<1x1x128xf32, #tpu.memory_space<vmem>>, vector<1x1x128xf32>
      %78 = vector.shape_cast %77 : vector<1x1x128xf32> to vector<1x128xf32>
      %79 = vector.broadcast %78 : vector<1x128xf32> to vector<128x128xf32>
      %80 = arith.addf %76, %79 : vector<128x128xf32>
      %cst_48 = arith.constant 0.000000e+00 : f32
      %81 = vector.broadcast %cst_48 : f32 to vector<128x128xf32>
      %82 = arith.maximumf %80, %81 : vector<128x128xf32>
      %83 = arith.truncf %82 : vector<128x128xf32> to vector<128x128xbf16>
      %c0_49 = arith.constant 0 : index
      %c0_50 = arith.constant 0 : index
      %c0_51 = arith.constant 0 : index
      %84 = vector.load %arg13[%c0_49, %c0_50, %c0_51] : memref<1x128x128xbf16, #tpu.memory_space<vmem>>, vector<1x128x128xbf16>
      %85 = vector.shape_cast %84 : vector<1x128x128xbf16> to vector<128x128xbf16>
      %cst_52 = arith.constant dense<0.000000e+00> : vector<128x128xf32>
      %86 = tpu.matmul %83, %85, %cst_52 {dimension_numbers = #tpu.dot_dimension_numbers<[1], [0], [0], [1], [0, 0, 1, 1], [], []>} : vector<128x128xbf16>, vector<128x128xbf16>, vector<128x128xf32> -> vector<128x128xf32>
      %c0_53 = arith.constant 0 : index
      %c0_54 = arith.constant 0 : index
      %c0_55 = arith.constant 0 : index
      %87 = vector.load %arg14[%c0_53, %c0_54, %c0_55] : memref<1x1x128xf32, #tpu.memory_space<vmem>>, vector<1x1x128xf32>
      %88 = vector.shape_cast %87 : vector<1x1x128xf32> to vector<1x128xf32>
      %89 = vector.broadcast %88 : vector<1x128xf32> to vector<128x128xf32>
      %90 = arith.addf %86, %89 : vector<128x128xf32>
      %91 = vector.broadcast %34 : vector<128x1xf32> to vector<128x128xf32>
      %92 = arith.mulf %90, %91 : vector<128x128xf32>
      %cst_56 = arith.constant dense<0.000000e+00> : vector<128xf32>
      %93 = vector.multi_reduction <add>, %92, %cst_56 [0] : vector<128x128xf32> to vector<128xf32>
      %94 = vector.shape_cast %93 : vector<128xf32> to vector<1x128xf32>
      %cst_57 = arith.constant 1.250000e-01 : f32
      %95 = vector.broadcast %cst_57 : f32 to vector<1x128xf32>
      %96 = arith.mulf %94, %95 : vector<1x128xf32>
      %97 = vector.broadcast %96 : vector<1x128xf32> to vector<128x128xf32>
      %98 = arith.subf %90, %97 : vector<128x128xf32>
      %99 = arith.mulf %98, %98 : vector<128x128xf32>
      %100 = vector.broadcast %34 : vector<128x1xf32> to vector<128x128xf32>
      %101 = arith.mulf %99, %100 : vector<128x128xf32>
      %cst_58 = arith.constant dense<0.000000e+00> : vector<128xf32>
      %102 = vector.multi_reduction <add>, %101, %cst_58 [0] : vector<128x128xf32> to vector<128xf32>
      %103 = vector.shape_cast %102 : vector<128xf32> to vector<1x128xf32>
      %cst_59 = arith.constant 1.250000e-01 : f32
      %104 = vector.broadcast %cst_59 : f32 to vector<1x128xf32>
      %105 = arith.mulf %103, %104 : vector<1x128xf32>
      %106 = vector.broadcast %96 : vector<1x128xf32> to vector<128x128xf32>
      %107 = arith.subf %90, %106 : vector<128x128xf32>
      %cst_60 = arith.constant 9.99999974E-6 : f32
      %108 = vector.broadcast %cst_60 : f32 to vector<1x128xf32>
      %109 = arith.addf %105, %108 : vector<1x128xf32>
      %110 = math.rsqrt %109 : vector<1x128xf32>
      %111 = vector.broadcast %110 : vector<1x128xf32> to vector<128x128xf32>
      %112 = arith.mulf %107, %111 : vector<128x128xf32>
      %c0_61 = arith.constant 0 : index
      %c0_62 = arith.constant 0 : index
      %c0_63 = arith.constant 0 : index
      %113 = vector.load %arg15[%c0_61, %c0_62, %c0_63] : memref<1x1x128xf32, #tpu.memory_space<vmem>>, vector<1x1x128xf32>
      %114 = vector.shape_cast %113 : vector<1x1x128xf32> to vector<1x128xf32>
      %115 = vector.broadcast %114 : vector<1x128xf32> to vector<128x128xf32>
      %116 = arith.mulf %112, %115 : vector<128x128xf32>
      %c0_64 = arith.constant 0 : index
      %c0_65 = arith.constant 0 : index
      %c0_66 = arith.constant 0 : index
      %117 = vector.load %arg16[%c0_64, %c0_65, %c0_66] : memref<1x1x128xf32, #tpu.memory_space<vmem>>, vector<1x1x128xf32>
      %118 = vector.shape_cast %117 : vector<1x1x128xf32> to vector<1x128xf32>
      %119 = vector.broadcast %118 : vector<1x128xf32> to vector<128x128xf32>
      %120 = arith.addf %116, %119 : vector<128x128xf32>
      %121 = vector.broadcast %34 : vector<128x1xf32> to vector<128x128xf32>
      %122 = arith.mulf %120, %121 : vector<128x128xf32>
      %c1_i32 = arith.constant 1 : i32
      %123 = arith.cmpi ne, %arg0, %c1_i32 : i32
      %124 = arith.extui %123 : i1 to i32
      %c0_i32_67 = arith.constant 0 : i32
      %125 = arith.cmpi ne, %124, %c0_i32_67 : i32
      scf.if %125 {
        %cst_70 = arith.constant 0.000000e+00 : f32
        %129 = vector.broadcast %cst_70 : f32 to vector<128x128xf32>
        %130 = arith.maximumf %122, %129 : vector<128x128xf32>
        %c0_71 = arith.constant 0 : index
        %c0_72 = arith.constant 0 : index
        %131 = vector.load %arg18[%c0_71, %c0_72] : memref<128x128xf32, #tpu.memory_space<vmem>>, vector<128x128xf32>
        tpu.vector_store %arg18[%c0_71, %c0_72], %130 {strides = array<i32>} : memref<128x128xf32, #tpu.memory_space<vmem>>, vector<128x128xf32>,
      } else {
      }
      %c1_i32_68 = arith.constant 1 : i32
      %126 = arith.cmpi eq, %arg0, %c1_i32_68 : i32
      %127 = arith.extui %126 : i1 to i32
      %c0_i32_69 = arith.constant 0 : i32
      %128 = arith.cmpi ne, %127, %c0_i32_69 : i32
      scf.if %128 {
        %c0_70 = arith.constant 0 : index
        %c0_71 = arith.constant 0 : index
        %129 = vector.load %arg18[%c0_70, %c0_71] : memref<128x128xf32, #tpu.memory_space<vmem>>, vector<128x128xf32>
        tpu.vector_store %arg18[%c0_70, %c0_71], %122 {strides = array<i32>} : memref<128x128xf32, #tpu.memory_space<vmem>>, vector<128x128xf32>,
        %c0_72 = arith.constant 0 : index
        %c0_73 = arith.constant 0 : index
        %130 = vector.load %arg17[%c0_72, %c0_73] : memref<128x128xf32, #tpu.memory_space<vmem>>, vector<128x128xf32>
        tpu.vector_store %arg17[%c0_72, %c0_73], %122 {strides = array<i32>} : memref<128x128xf32, #tpu.memory_space<vmem>>, vector<128x128xf32>,
      } else {
      }
    } else {
    }
    return
  }
  func.func @transform_0(%arg0: i32, %arg1: i32) -> (i32, i32) {
    %c0_i32 = arith.constant 0 : i32
    %c0_i32_0 = arith.constant 0 : i32
    %c0_i32_1 = arith.constant 0 : i32
    return %c0_i32, %c0_i32_0 : i32, i32
  }
  func.func @transform_1(%arg0: i32, %arg1: i32) -> (i32, i32) {
    %c0_i32 = arith.constant 0 : i32
    %c0_i32_0 = arith.constant 0 : i32
    return %arg1, %c0_i32 : i32, i32
  }
  func.func @transform_2(%arg0: i32, %arg1: i32) -> (i32, i32) {
    %c0_i32 = arith.constant 0 : i32
    %c0_i32_0 = arith.constant 0 : i32
    return %c0_i32, %arg1 : i32, i32
  }
  func.func @transform_3(%arg0: i32, %arg1: i32) -> (i32, i32) {
    %c0_i32 = arith.constant 0 : i32
    %c0_i32_0 = arith.constant 0 : i32
    return %arg1, %c0_i32 : i32, i32
  }
  func.func @transform_4(%arg0: i32, %arg1: i32) -> (i32, i32) {
    %c0_i32 = arith.constant 0 : i32
    %c0_i32_0 = arith.constant 0 : i32
    return %arg1, %c0_i32 : i32, i32
  }
  func.func @transform_5(%arg0: i32, %arg1: i32) -> i32 {
    %c0_i32 = arith.constant 0 : i32
    %c0_i32_0 = arith.constant 0 : i32
    return %c0_i32 : i32
  }
  func.func @transform_6(%arg0: i32, %arg1: i32) -> (i32, i32, i32) {
    %c0_i32 = arith.constant 0 : i32
    %c0_i32_0 = arith.constant 0 : i32
    %c0_i32_1 = arith.constant 0 : i32
    return %arg0, %c0_i32, %c0_i32_0 : i32, i32, i32
  }
  func.func @transform_7(%arg0: i32, %arg1: i32) -> (i32, i32, i32) {
    %c0_i32 = arith.constant 0 : i32
    %c0_i32_0 = arith.constant 0 : i32
    %c0_i32_1 = arith.constant 0 : i32
    return %arg0, %c0_i32, %c0_i32_0 : i32, i32, i32
  }
  func.func @transform_8(%arg0: i32, %arg1: i32) -> (i32, i32, i32) {
    %c0_i32 = arith.constant 0 : i32
    %c0_i32_0 = arith.constant 0 : i32
    %c0_i32_1 = arith.constant 0 : i32
    return %arg0, %c0_i32, %c0_i32_0 : i32, i32, i32
  }
  func.func @transform_9(%arg0: i32, %arg1: i32) -> (i32, i32, i32) {
    %c0_i32 = arith.constant 0 : i32
    %c0_i32_0 = arith.constant 0 : i32
    %c0_i32_1 = arith.constant 0 : i32
    return %arg0, %c0_i32, %c0_i32_0 : i32, i32, i32
  }
  func.func @transform_10(%arg0: i32, %arg1: i32) -> (i32, i32, i32) {
    %c0_i32 = arith.constant 0 : i32
    %c0_i32_0 = arith.constant 0 : i32
    %c0_i32_1 = arith.constant 0 : i32
    return %arg0, %c0_i32, %c0_i32_0 : i32, i32, i32
  }
  func.func @transform_11(%arg0: i32, %arg1: i32) -> (i32, i32, i32) {
    %c0_i32 = arith.constant 0 : i32
    %c0_i32_0 = arith.constant 0 : i32
    %c0_i32_1 = arith.constant 0 : i32
    return %arg0, %c0_i32, %c0_i32_0 : i32, i32, i32
  }
  func.func @transform_12(%arg0: i32, %arg1: i32) -> (i32, i32, i32) {
    %c0_i32 = arith.constant 0 : i32
    %c0_i32_0 = arith.constant 0 : i32
    %c0_i32_1 = arith.constant 0 : i32
    return %arg0, %c0_i32, %c0_i32_0 : i32, i32, i32
  }
  func.func @transform_13(%arg0: i32, %arg1: i32) -> (i32, i32, i32) {
    %c0_i32 = arith.constant 0 : i32
    %c0_i32_0 = arith.constant 0 : i32
    %c0_i32_1 = arith.constant 0 : i32
    return %arg0, %c0_i32, %c0_i32_0 : i32, i32, i32
  }
  func.func @transform_14(%arg0: i32, %arg1: i32) -> (i32, i32, i32) {
    %c0_i32 = arith.constant 0 : i32
    %c0_i32_0 = arith.constant 0 : i32
    %c0_i32_1 = arith.constant 0 : i32
    return %arg0, %c0_i32, %c0_i32_0 : i32, i32, i32
  }
  func.func @transform_15(%arg0: i32, %arg1: i32) -> (i32, i32) {
    %c0_i32 = arith.constant 0 : i32
    %c0_i32_0 = arith.constant 0 : i32
    %c0_i32_1 = arith.constant 0 : i32
    return %c0_i32, %c0_i32_0 : i32, i32
  }
}

</mosaic_0001>

<bundles_post_ra>
// kernel: tpu_custom_call.1
= control target key start
LH: loop header
LB: loop body
LE: loop exit
PB: predicated region body
PF: predicated region fallthrough
CT: control target
= control target key end

     0   :  { %s4612_s0 = inlined_call_operand.vmem [shape: f32[128,128], index: 0, kind: input, shape index: {}]   ;;  %s4613_s1 = inlined_call_operand.hbm [shape: bf16[128,128], index: 1, kind: input, shape index: {}]   ;;  %s4614_s2 = inlined_call_operand.hbm [shape: bf16[128,128], index: 2, kind: input, shape index: {}]   ;;  %s4615_s3 = inlined_call_operand.hbm [shape: bf16[128,128], index: 3, kind: input, shape index: {}]   ;;  %s4616_s4 = inlined_call_operand.vmem [shape: f32[128,1], index: 4, kind: input, shape index: {}]   ;;  %s4617_s5 = inlined_call_operand.hbm [shape: f32[2], index: 5, kind: input, shape index: {}]   ;;  %s4618_s6 = inlined_call_operand.hbm [shape: bf16[2,128,128], index: 6, kind: input, shape index: {}]   ;;  %s4619_s7 = inlined_call_operand.hbm [shape: bf16[2,128,128], index: 7, kind: input, shape index: {}]   ;;  %s4620_s8 = inlined_call_operand.vmem [shape: f32[2,1,128], index: 8, kind: input, shape index: {}]   ;;  %s4621_s9 = inlined_call_operand.vmem [shape: f32[2,1,128], index: 9, kind: input, shape index: {}]   ;;  %s4622_s10 = inlined_call_operand.vmem [shape: f32[2,1,128], index: 10, kind: input, shape index: {}]   ;;  %s4623_s11 = inlined_call_operand.hbm [shape: bf16[2,128,128], index: 11, kind: input, shape index: {}]   ;;  %s4624_s12 = inlined_call_operand.vmem [shape: f32[2,1,128], index: 12, kind: input, shape index: {}]   ;;  %s4625_s13 = inlined_call_operand.vmem [shape: f32[2,1,128], index: 13, kind: input, shape index: {}]   ;;  %s4626_s14 = inlined_call_operand.vmem [shape: f32[2,1,128], index: 14, kind: input, shape index: {}]   ;;  %s4627_s15 = inlined_call_operand.hbm [shape: f32[128,128], index: 15, kind: output, shape index: {}]  }
   0x1   :  { %4645 = sst [smem:[#allocation35_spill]] %s4612_s0 }
   0x2   :  { %4646 = sst [smem:[#allocation36_spill]] %s4613_s1 }
   0x3   :  { %4647 = sst [smem:[#allocation37_spill]] %s4614_s2 }
   0x4   :  { %4648 = sst [smem:[#allocation38_spill]] %s4615_s3 }
   0x5   :  { %4649 = sst [smem:[#allocation39_spill]] %s4616_s4 }
   0x6   :  { %4650 = sst [smem:[#allocation40_spill]] %s4617_s5 }
   0x7   :  { %4651 = sst [smem:[#allocation41_spill]] %s4618_s6 }
   0x8   :  { %4652 = sst [smem:[#allocation42_spill]] %s4619_s7 }
   0x9   :  { %4653 = sst [smem:[#allocation43_spill]] %s4622_s10 }
   0xa   :  { %4654 = sst [smem:[#allocation44_spill]] %s4624_s12 }
   0xb   :  { %4655 = sst [smem:[#allocation45_spill]] %s4625_s13 }
   0xc   :  { %4656 = sst [smem:[#allocation46_spill]] %s4626_s14 }
   0xd   :  { %4657 = sst [smem:[#allocation47_spill]] %s4627_s15 }
   0xe   :  { %20 = vsyncpa [#allocation6], 0 }
   0xf   :  { %21 = vsyncpa [#allocation10], 0 }
  0x10   :  { %22 = vsyncpa [#allocation8], 0 }
  0x11   :  { %23 = vsyncpa [#allocation14], 0 }
  0x12   :  { %25 = vsyncpa [#allocation14 + $0x1], 0 }
  0x13   :  { %26 = vsyncpa [#allocation17], 0 }
  0x14   :  { %28 = vsyncpa [#allocation17 + $0x1], 0 }
  0x15   :  { %29 = vsyncpa [#allocation7], 0  ;;  %s3865_s18 = smov 0   ;;  %s3867_s19 = smov 0  }
  0x16   :  { %s3869_s20 = smov 0   ;;  %s3871_s21 = smov 0  }
  0x17   :  { %s3873_s22 = smov 0   ;;  %s3875_s23 = smov 0  }
  0x18 LB: > { %4658 = sst [smem:[#allocation25_spill]] %s3766_s22  ;;  %s3894_s24 = sadd.s32 4294967295, %s3770_s23   ;;  %s3770_s23 = sphi %s3875_s23, %s35_s23   ;;  %s3766_s22 = sphi %s3873_s22, %s4709_s22   ;;  %s3762_s21 = sphi %s3871_s21, %s4708_s21   ;;  %s3758_s20 = sphi %s3869_s20, %s4712_s20   ;;  %s3754_s19 = sphi %s3867_s19, %s4711_s19   ;;  %s3750_s18 = sphi %s3865_s18, %s4710_s18  }
  0x19   : > { %4659 = sst [smem:[#allocation26_spill]] %s3770_s23  ;;  %p213_p0 = scmp.ne.s32.totalorder %s3754_s19, %s3750_s18 }
  0x1a   : > { %p4638_p1 = scmp.eq.s32.totalorder %s3894_s24, 0  ;;  %p2891_p2 = scmp.ge.s32.totalorder %s3770_s23, 1 }
  0x1b   : > { %p453_p3 = scmp.lt.s32.totalorder %s3770_s23, 3  ;;  %s3772_s27 = smov [#allocation9]  }
  0x1c   : > { %p3902_p4 = por %p4638_p1, %p213_p0  ;;  %s486_s28 = sshll.u32 %s3772_s27, 4  ;;  %s487_s28 = int_to_ptr.vmem [resolvable:$true] %s486_s28 }
  0x1d   : > { %p3906_p5 = pnand %p2891_p2, %p453_p3  ;;  %s47_s30 = sadd.s32 1, %s3766_s22 }
  0x1e   : > { %s3514_s16 = scalar_lea.vmem %s487_s28, 1024  ;;  %p3522_p12 = scmp.lt.s32.totalorder %s487_s28, %s487_s28 }
  0x1f   : > { %p3349_p6 = pneg %p3906_p5  ;;  %p3515_p9 = scmp.ne.s32.totalorder %s487_s28, %s3514_s16 }
  0x20   : > { %p3523_p13 = scmp.lt.s32.totalorder %s3514_s16, %s3514_s16 }
  0x21   : > { %p3914_p7 = pnand %p3349_p6, %p4638_p1 }
  0x22   : > { %p3524_p0 = por %p3523_p13, %p3522_p12 }
  0x23   : > { %p3505_p8 = pneg %p3914_p7 }
  0x25   : > { %p3517_p10 = pnand %p3515_p9, %p3505_p8 }
  0x27   : > { %p3518_p11 = pneg %p3517_p10 }
  0x29   : > { %p3525_p2 = pnand %p3524_p0, %p3518_p11 }
  0x2b   : > { %3528 = shalt.err (!%p3525_p2)
}
  0x2c   : > { %s4630_s17 = smov 64   ;;  %s4632_s18 = smov 4  }
  0x2d   : > { %s4663_s2 = sld [smem:[#allocation37_spill]]  ;;  %p49_p3 = scmp.ge.s32.totalorder %s47_s30, 2 }
  0x2e   : > { %s200_s15 = sadd.s32 1, %s3758_s20  ;;  %p207_p6 = scmp.ne.s32.totalorder %s3758_s20, %s3754_s19 }
  0x2f   : > { %p208_p9 = scmp.eq.s32.totalorder %s3770_s23, 0  ;;  %s4714_s30 = smov (%p49_p3, %s47_s30), 0 }
  0x30   : > { %4664 = sst [smem:[#allocation27_spill]] %s4714_s30  ;;  %p3376_p11 = scmp.lt.s32.totalorder %s3770_s23, 2 }
  0x31   : > { %p209_p10 = por %p208_p9, %p207_p6  ;;  %s197_s4 = ssub.s32 %s3766_s22, %s4714_s30 }
  0x32   : > { %s534_s0 = sand.u32 1, %s3770_s23   ;;  %p198_p12 = scmp.eq.s32.totalorder %s197_s4, 0 }
  0x33   : > { %3355 = dma.hbm_to_vmem [thread:$0]  (!%p3914_p7), %s4663_s2, 1024, %s487_s28, [#allocation10], %s4630_s17, %s4630_s17, %s4632_s18  }
  0x34   : > { %s4635_s14 = sand.u32 1, %s3758_s20   ;;  %s3944_s13 = sshll.u32 %s3766_s22, 10 }
  0x35   : > { %s3947_s12 = scalar_select %p198_p12, %s3758_s20, %s200_s15  }
  0x36   : > { %s3951_s28 = sshll.u32 %s4635_s14, 6  ;;  %s4666_s6 = sld [smem:[#allocation41_spill]] }
  0x37   : > { %4665 = sst [smem:[#allocation28_spill]] %s3947_s12  ;;  %p3957_p13 = pnand %p3376_p11, %p209_p10 }
  0x38   : > { %s538_s4 = scalar_lea.vmem [#allocation13], %s3951_s28  ;;  %s3962_s30 = scalar_lea.sflag [#allocation14], %s534_s0 }
  0x39   : > { %s545_s2 = sshll.u32 %s538_s4, 4  ;;  %p3531_p0 = pneg %p3957_p13  ;;  %s546_s2 = int_to_ptr.vmem [resolvable:$true] %s545_s2 }
  0x3a   : > { %s3542_s15 = scalar_lea.vmem %s546_s2, 1024  ;;  %s3775_s27 = smov [#allocation13]  }
  0x3b   : > { %p3543_p2 = scmp.ne.s32.totalorder %s546_s2, %s3542_s15  ;;  %s3547_s16 = sshll.u32 %s3775_s27, 4  ;;  %s3548_s16 = int_to_ptr.vmem [resolvable:$false] %s3547_s16 }
  0x3c   : > { %s544_s17 = scalar_lea.hbm %s4666_s6, %s3944_s13  ;;  %s3549_s14 = scalar_lea.vmem %s3548_s16, 2048 }
  0x3d   : > { %p3545_p3 = pnand %p3543_p2, %p3531_p0  ;;  %p3550_p9 = scmp.lt.s32.totalorder %s546_s2, %s3548_s16 }
  0x3e   : > { %p3551_p10 = scmp.lt.s32.totalorder %s3549_s14, %s3542_s15 }
  0x3f   : > { %p3546_p6 = pneg %p3545_p3 }
  0x40   : > { %p3552_p11 = por %p3551_p10, %p3550_p9 }
  0x42   : > { %p3553_p12 = pnand %p3552_p11, %p3546_p6 }
  0x44   : > { %3556 = shalt.err (!%p3553_p12)
}
  0x45   : > { %s4668_s0 = smov 4   ;;  %s4669_s4 = smov 64  }
  0x46   : > { %3365 = dma.hbm_to_vmem [thread:$0]  (!%p3957_p13), %s544_s17, 1024, %s546_s2, %s3962_s30, %s4669_s4, %s4669_s4, %s4668_s0  }
  0x47   : > { %s3776_s6 = smov [#allocation5]   ;;  %s3777_s12 = smov [#allocation11]  }
  0x48   : > { %s471_s22 = sshll.u32 %s3776_s6, 4  ;;  %s502_s27 = sshll.u32 %s3777_s12, 4  ;;  %s472_s22 = int_to_ptr.vmem [resolvable:$true] %s471_s22  ;;  %s503_s27 = int_to_ptr.vmem [resolvable:$true] %s502_s27 }
  0x49   : > { %s3568_s23 = scalar_lea.vmem %s472_s22, 1024  ;;  %p3576_p9 = scmp.lt.s32.totalorder %s472_s22, %s472_s22 }
  0x4a   : > { %p3569_p2 = scmp.ne.s32.totalorder %s472_s22, %s3568_s23  ;;  %p3577_p10 = scmp.lt.s32.totalorder %s3568_s23, %s3568_s23 }
  0x4c   : > { %p3571_p3 = pnand %p3569_p2, %p3505_p8  ;;  %p3578_p11 = por %p3577_p10, %p3576_p9 }
  0x4e   : > { %p3572_p6 = pneg %p3571_p3 }
  0x50   : > { %p3579_p12 = pnand %p3578_p11, %p3572_p6 }
  0x52   : > { %3582 = shalt.err (!%p3579_p12)
}
  0x53   : > { %s4670_s1 = sld [smem:[#allocation36_spill]]  ;;  %s3594_s12 = scalar_lea.vmem %s503_s27, 1024 }
  0x54   : > { %p3595_p1 = scmp.ne.s32.totalorder %s503_s27, %s3594_s12  ;;  %p3602_p9 = scmp.lt.s32.totalorder %s503_s27, %s503_s27 }
  0x55   : > { %p3603_p6 = scmp.lt.s32.totalorder %s3594_s12, %s3594_s12 }
  0x56   : > { %p3597_p2 = pnand %p3595_p1, %p3505_p8 }
  0x57   : > { %p3604_p10 = por %p3603_p6, %p3602_p9 }
  0x58   : > { %p3598_p3 = pneg %p3597_p2 }
  0x59   : > { %3352 = dma.hbm_to_vmem [thread:$0]  (!%p3914_p7), %s4670_s1, 1024, %s472_s22, [#allocation6], %s4669_s4, %s4669_s4, %s4668_s0  }
  0x5a   : > { %p3605_p11 = pnand %p3604_p10, %p3598_p3 }
  0x5c   : > { %3608 = shalt.err (!%p3605_p11)
}
  0x5d   : > { %s4671_s3 = sld [smem:[#allocation38_spill]]  ;;  %s3778_s22 = smov [#allocation12]  }
  0x5e   : > { %s4672_s5 = sld [smem:[#allocation40_spill]]  ;;  %s559_s12 = scalar_lea.vmem [#allocation15], %s3951_s28 }
  0x5f   : > { %s4673_s7 = sld [smem:[#allocation42_spill]]  ;;  %s566_s1 = sshll.u32 %s559_s12, 4  ;;  %s567_s1 = int_to_ptr.vmem [resolvable:$true] %s566_s1 }
  0x60   : > { %s3633_s10 = scalar_lea.vmem %s567_s1, 1024 }
  0x61   : > { %p3634_p1 = scmp.ne.s32.totalorder %s567_s1, %s3633_s10 }
  0x63   : > { %3358 = dma.hbm_to_vmem [thread:$0]  (!%p3914_p7), %s4671_s3, 1024, %s503_s27, [#allocation10], %s4669_s4, %s4669_s4, %s4668_s0  }
  0x64   : > { %3361 = dma.hbm_to_smem (!%p3914_p7), %s4672_s5, 16, %s3778_s22, [#allocation8]  }
  0x65   : > { %s565_s6 = scalar_lea.hbm %s4673_s7, %s3944_s13  ;;  %p3636_p8 = pnand %p3634_p1, %p3531_p0 }
  0x66   : > { %s3779_s27 = smov [#allocation15]  }
  0x67   : > { %p3637_p12 = pneg %p3636_p8  ;;  %s3638_s14 = sshll.u32 %s3779_s27, 4  ;;  %s3639_s14 = int_to_ptr.vmem [resolvable:$false] %s3638_s14 }
  0x68   : > { %s3640_s29 = scalar_lea.vmem %s3639_s14, 2048  ;;  %p3641_p2 = scmp.lt.s32.totalorder %s567_s1, %s3639_s14 }
  0x69   : > { %p3642_p3 = scmp.lt.s32.totalorder %s3640_s29, %s3633_s10 }
  0x6b   : > { %p3643_p7 = por %p3642_p3, %p3641_p2 }
  0x6d   : > { %p3644_p9 = pnand %p3643_p7, %p3637_p12 }
  0x6f   : > { %3647 = shalt.err (!%p3644_p9)
}
  0x70   : > { %3368 = dma.hbm_to_vmem [thread:$0]  (!%p3957_p13), %s565_s6, 1024, %s567_s1, %s3962_s30, %s4669_s4, %s4669_s4, %s4668_s0  }
  0x71   : > { %s604_s17 = scalar_lea.hbm %s4623_s11, %s3944_s13  ;;  %s598_s15 = scalar_lea.vmem [#allocation16], %s3951_s28 }
  0x72   : > { %s605_s10 = sshll.u32 %s598_s15, 4  ;;  %s4674_s16 = sand.u32 1, %s3758_s20   ;;  %s606_s10 = int_to_ptr.vmem [resolvable:$true] %s605_s10 }
  0x73   : > { %s595_s2 = scalar_lea.sflag [#allocation17], %s4674_s16  ;;  %s3661_s12 = scalar_lea.vmem %s606_s10, 1024 }
  0x74   : > { %p3662_p6 = scmp.ne.s32.totalorder %s606_s10, %s3661_s12  ;;  %s3780_s27 = smov [#allocation16]  }
  0x75   : > { %s3666_s14 = sshll.u32 %s3780_s27, 4  ;;  %s3667_s14 = int_to_ptr.vmem [resolvable:$false] %s3666_s14 }
  0x76   : > { %p3664_p10 = pnand %p3662_p6, %p3531_p0  ;;  %s3668_s29 = scalar_lea.vmem %s3667_s14, 2048 }
  0x77   : > { %p3669_p1 = scmp.lt.s32.totalorder %s606_s10, %s3667_s14  ;;  %p3670_p8 = scmp.lt.s32.totalorder %s3668_s29, %s3661_s12 }
  0x78   : > { %p3665_p11 = pneg %p3664_p10 }
  0x79   : > { %p3671_p12 = por %p3670_p8, %p3669_p1 }
  0x7b   : > { %p3672_p2 = pnand %p3671_p12, %p3665_p11 }
  0x7d   : > { %3675 = shalt.err (!%p3672_p2)
}
  0x7e   : > { %3371 = dma.hbm_to_vmem [thread:$0]  (!%p3957_p13), %s604_s17, 1024, %s606_s10, %s595_s2, %s4669_s4, %s4669_s4, %s4668_s0  }
  0x7f   : > { %635 = sbr.rel (%p3906_p5) target bundleno = 1395 (0x573), region = 80 }
  0x84   : > { %p4675_p0 = scmp.eq.s32.totalorder %s3894_s24, 0 }
  0x86   : > { %3725 = dma.done.wait (%p4675_p0), [#allocation6], 1024   ;;  %p4676_p3 = pmov %p4675_p0 }
  0x87   : > { %p4677_p7 = pmov %p4675_p0 }
  0x88   : > { %3727 = vsyncadd (%p4676_p3), [#allocation6], 4294966272 }
  0x89   : > { %3729 = dma.done.wait (%p4677_p7), [#allocation10], 2048   ;;  %p4678_p9 = pmov %p4675_p0 }
  0x8a   : > { %p4679_p6 = pmov %p4675_p0 }
  0x8b   : > { %3731 = vsyncadd (%p4678_p9), [#allocation10], 4294965248 }
  0x8c   : > { %3733 = dma.done.wait (%p4679_p6), [#allocation8], 16   ;;  %p4680_p13 = pmov %p4675_p0 }
  0x8d   : > { %s653_s1 = sand.u32 1, %s3894_s24   ;;  %s655_s13 = sand.u32 1, %s3754_s19  }
  0x8e   : > { %3735 = vsyncadd (%p4680_p13), [#allocation8], 4294967280  ;;  %s2912_s26 = sshll.u32 %s655_s13, 6  ;;  %s654_s30 = scalar_lea.sflag [#allocation14], %s653_s1 }
  0x8f   : > { %s4047_s18 = scalar_lea.vmem [#allocation13], %s2912_s26 }
  0x90   : > { %3737 = dma.done.wait (%p3902_p4), %s654_s30, 2048  }
  0x91   : > { %3739 = vsyncadd (%p3902_p4), %s654_s30, 4294965248  ;;  %s4053_s28 = scalar_lea.vmem [#allocation15], %s2912_s26  ;;  %s672_s0 = scalar_lea.sflag [#allocation17], %s655_s13 }
  0x92   : > { %s4055_s4 = scalar_lea.vmem [#allocation16], %s2912_s26 }
  0x93   : > { %3741 = dma.done.wait (%p3902_p4), %s672_s0, 1024  }
  0x94   : > { %3743 = vsyncadd (%p3902_p4), %s672_s0, 4294966272 }
  0x95   : > { %680 = sfence }
  0x96   : > { %p759_p5 = scmp.lt.s32.totalorder %s3762_s21, 1  ;;  %p778_p10 = scmp.eq.s32.totalorder %s3762_s21, 0 }
  0x97   : > { %s4681_s12 = sld [smem:[#allocation43_spill]] }
  0x98   : > { %s4064_s6 = scalar_select %p759_p5, %s3762_s21, 1 }
  0x99   : > { %s4682_s1 = sld [smem:[#allocation44_spill]] }
  0x9a   : > { %s4683_s0 = sld [smem:[#allocation45_spill]] }
  0x9b   : > { %s4684_s5 = sld [smem:[#allocation46_spill]] }
  0x9c   : > { %s4685_s15 = sld [smem:[#allocation35_spill]] (%p778_p10) }
  0x9d   : > { %s767_s27 = scalar_lea.vmem %s4681_s12, %s4064_s6  ;;  %783 = sbr.rel (!%p778_p10) target bundleno = 171 (0xab), region = 112 }
  0x9f   : > { %s770_s13 = scalar_lea.vmem %s4682_s1, %s4064_s6 }
  0xa0   : > { %s773_s23 = scalar_lea.vmem %s4683_s0, %s4064_s6 }
  0xa1   : > { %s776_s17 = scalar_lea.vmem %s4684_s5, %s4064_s6 }
  0xa2   : > { %v784_v0 = vld [vmem:[%s4685_s15] sm:$0xff]  ;;  %v785_v1 = vld [vmem:[%s4685_s15 + $0x8] sm:$0xff]  ;;  %v786_v2 = vld [vmem:[%s4685_s15 + $0x10] sm:$0xff] }
  0xa3   : > { %800 = vst [vmem:[#allocation2 + $0x30] sm:$0xff] %v784_v0  ;;  %801 = vst [vmem:[#allocation2] sm:$0xff] %v785_v1  ;;  %v787_v3 = vld [vmem:[%s4685_s15 + $0x18] sm:$0xff]  ;;  %v788_v4 = vld [vmem:[%s4685_s15 + $0x20] sm:$0xff] }
  0xa4   : > { %802 = vst [vmem:[#allocation2 + $0x58] sm:$0xff] %v786_v2  ;;  %v789_v5 = vld [vmem:[%s4685_s15 + $0x28] sm:$0xff]  ;;  %803 = vst [vmem:[#allocation2 + $0x18] sm:$0xff] %v787_v3  ;;  %v790_v6 = vld [vmem:[%s4685_s15 + $0x30] sm:$0xff] }
  0xa5   : > { %804 = vst [vmem:[#allocation2 + $0x50] sm:$0xff] %v788_v4  ;;  %805 = vst [vmem:[#allocation2 + $0x68] sm:$0xff] %v789_v5  ;;  %v791_v7 = vld [vmem:[%s4685_s15 + $0x38] sm:$0xff]  ;;  %v792_v8 = vld [vmem:[%s4685_s15 + $0x40] sm:$0xff] }
  0xa6   : > { %806 = vst [vmem:[#allocation2 + $0x8] sm:$0xff] %v790_v6  ;;  %807 = vst [vmem:[#allocation2 + $0x48] sm:$0xff] %v791_v7  ;;  %v793_v9 = vld [vmem:[%s4685_s15 + $0x48] sm:$0xff]  ;;  %v794_v10 = vld [vmem:[%s4685_s15 + $0x50] sm:$0xff] }
  0xa7   : > { %808 = vst [vmem:[#allocation2 + $0x40] sm:$0xff] %v792_v8  ;;  %v795_v11 = vld [vmem:[%s4685_s15 + $0x58] sm:$0xff]  ;;  %809 = vst [vmem:[#allocation2 + $0x20] sm:$0xff] %v793_v9  ;;  %v796_v12 = vld [vmem:[%s4685_s15 + $0x60] sm:$0xff] }
  0xa8   : > { %810 = vst [vmem:[#allocation2 + $0x10] sm:$0xff] %v794_v10  ;;  %811 = vst [vmem:[#allocation2 + $0x38] sm:$0xff] %v795_v11  ;;  %v797_v13 = vld [vmem:[%s4685_s15 + $0x68] sm:$0xff]  ;;  %v798_v14 = vld [vmem:[%s4685_s15 + $0x70] sm:$0xff] }
  0xa9   : > { %812 = vst [vmem:[#allocation2 + $0x60] sm:$0xff] %v796_v12  ;;  %813 = vst [vmem:[#allocation2 + $0x70] sm:$0xff] %v797_v13  ;;  %v799_v15 = vld [vmem:[%s4685_s15 + $0x78] sm:$0xff] }
  0xaa   : > { %814 = vst [vmem:[#allocation2 + $0x78] sm:$0xff] %v798_v14  ;;  %815 = vst [vmem:[#allocation2 + $0x28] sm:$0xff] %v799_v15 }
  0xab PF: > { %v3443_v16 = vld [vmem:[%s4047_s18 + $0x38] sm:$0xff]   ;;  %v3444_v17 = vld [vmem:[%s4047_s18 + $0x30] sm:$0xff]   ;;  %v3781_v18 = vmov 0   ;;  %v3446_v22 = vld [vmem:[%s4047_s18 + $0x28] sm:$0xff]   ;;  %s4692_s16 = sld [smem:[#allocation39_spill]]  ;;  %s4699_s29 = scalar_lea.vmem %s4620_s8, %s4064_s6 }
  0xac   : > { %3441 = vset.pattern.permute.xlu0 %v3781_v18  ;;  %3442 = vset.pattern.permute.xlu1 %v3781_v18  ;;  %v3448_v31 = vld [vmem:[%s4047_s18 + $0x20] sm:$0xff]   ;;  %v4172_v36 = vld [vmem:[#allocation2 + $0x50] sm:$0xff]  ;;  %v4174_v37 = vld [vmem:[#allocation2 + $0x68] sm:$0xff]  ;;  %s1794_s2 = sld [smem:[#allocation12 + %s3762_s21]]  ;;  %s4700_s5 = scalar_lea.vmem %s4621_s9, %s4064_s6 }
  0xad   : > { %3147 = vmatprep.subr.bf16.mxu0 %v3443_v16  ;;  %v4166_v33 = vld [vmem:[#allocation2 + $0x8] sm:$0xff]  ;;  %v3450_v38 = vld [vmem:[%s4047_s18 + $0x18] sm:$0xff]   ;;  %v3033_v39 = vpack.c.bf16 %v4174_v37, %v4172_v36  ;;  %v3452_v44 = vld [vmem:[%s4047_s18 + $0x10] sm:$0xff]   ;;  %p2994_p4 = scmp.eq.s32.totalorder %s3762_s21, 1 }
  0xae   : > { %3148 = vmatpush3.bf16.msra.mxu0 %v3443_v16  ;;  %v4159_v29 = vld [vmem:[#allocation2 + $0x40] sm:$0xff]  ;;  %v4168_v34 = vld [vmem:[#allocation2 + $0x48] sm:$0xff]  ;;  %v4179_v41 = vld [vmem:[#allocation2 + $0x58] sm:$0xff] }
  0xaf   : > { %3149 = vmatprep.subr.bf16.mxu0 %v3444_v17  ;;  %v4153_v26 = vld [vmem:[#allocation2 + $0x10] sm:$0xff]  ;;  %v4155_v27 = vld [vmem:[#allocation2 + $0x38] sm:$0xff]  ;;  %v4161_v30 = vld [vmem:[#allocation2 + $0x20] sm:$0xff]  ;;  %v3038_v35 = vpack.c.bf16 %v4168_v34, %v4166_v33  ;;  %3061 = vst [vmem:[#allocation4 + $0x10] sm:$0xff] %v3033_v39  }
  0xb0   : > { %v4147_v23 = vld [vmem:[#allocation2 + $0x60] sm:$0xff]  ;;  %v4149_v24 = vld [vmem:[#allocation2 + $0x70] sm:$0xff]  ;;  %4690 = vst [vmem:[#allocation33_spill] sm:$0xff] %v4153_v26  ;;  %v3048_v28 = vpack.c.bf16 %v4155_v27, %v4153_v26  ;;  %4691 = vst [vmem:[#allocation34_spill] sm:$0xff] %v4161_v30  ;;  %v3043_v32 = vpack.c.bf16 %v4161_v30, %v4159_v29 }
  0xb1   : > { %v4140_v19 = vld [vmem:[#allocation2 + $0x78] sm:$0xff]  ;;  %v4142_v20 = vld [vmem:[#allocation2 + $0x28] sm:$0xff]  ;;  %4688 = vst [vmem:[#allocation31_spill] sm:$0xff] %v4147_v23  ;;  %4689 = vst [vmem:[#allocation32_spill] sm:$0xff] %v4149_v24  ;;  %v3053_v25 = vpack.c.bf16 %v4149_v24, %v4147_v23 }
  0xb2   : > { %4686 = vst [vmem:[#allocation29_spill] sm:$0xff] %v4140_v19  ;;  %4687 = vst [vmem:[#allocation30_spill] sm:$0xff] %v4142_v20  ;;  %v3058_v21 = vpack.c.bf16 %v4142_v20, %v4140_v19  ;;  %3150 = vmatpush3.bf16.msra.mxu0 %v3444_v17  ;;  %v4181_v42 = vld [vmem:[#allocation2 + $0x18] sm:$0xff]  ;;  %v3458_v47 = vld [vmem:[#allocation11] sm:$0xff]   ;;  %s1795_s12 = sadd.f32 1.0, %s1794_s2 }
  0xb3   : > { %3065 = vst [vmem:[#allocation4 + $0x30] sm:$0xff] %v3053_v25   ;;  %3151 = vmatprep.subr.bf16.mxu0 %v3446_v22  ;;  %3064 = vst [vmem:[#allocation4 + $0x28] sm:$0xff] %v3048_v28   ;;  %v3028_v45 = vpack.c.bf16 %v4181_v42, %v4179_v41  ;;  %v3454_v48 = vld [vmem:[%s4047_s18 + $0x8] sm:$0xff]   ;;  %3163 = vmatprep.mubr.bf16.mxu0 %v3458_v47  ;;  %v4187_v49 = vld [vmem:[#allocation2 + $0x30] sm:$0xff] }
  0xb4   : > { %3066 = vst [vmem:[#allocation4 + $0x38] sm:$0xff] %v3058_v21   ;;  %3063 = vst [vmem:[#allocation4 + $0x20] sm:$0xff] %v3043_v32   ;;  %v4189_v51 = vld [vmem:[#allocation2] sm:$0xff]  ;;  %v3459_v57 = vld [vmem:[#allocation11 + $0x8] sm:$0xff]  }
  0xb5   : > { %3062 = vst [vmem:[#allocation4 + $0x18] sm:$0xff] %v3038_v35   ;;  %3060 = vst [vmem:[#allocation4 + $0x8] sm:$0xff] %v3028_v45   ;;  %v3023_v52 = vpack.c.bf16 %v4189_v51, %v4187_v49  ;;  %v3461_v53 = vld [vmem:[#allocation5] sm:$0xff]   ;;  %v3463_v58 = vld [vmem:[#allocation11 + $0x10] sm:$0xff]  }
  0xb6   : > { %3152 = vmatpush3.bf16.msra.mxu0 %v3446_v22  ;;  %v3456_v54 = vld [vmem:[%s4047_s18] sm:$0xff]   ;;  %3195 = vmatprep.mubr.bf16.mxu1 %v3461_v53  ;;  %v3455_v56 = vld [vmem:[#allocation4 + $0x10] sm:$0xff]   ;;  %v3464_v62 = vld [vmem:[#allocation11 + $0x18] sm:$0xff]  }
  0xb7   : > { %3153 = vmatprep.subr.bf16.mxu0 %v3448_v31  ;;  %3024 = vst [vmem:[#allocation4] sm:$0xff] %v3023_v52   ;;  %v1411_v61 = vld [vmem:[%s4692_s16 + $0x70] sm:$0xff]  ;;  %v1409_v63 = vld [vmem:[%s4692_s16 + $0x60] sm:$0xff]  ;;  %v1412_v1 = vld [vmem:[%s4692_s16 + $0x78] sm:$0xff] }
  0xb8   : > { %1485 = vperm.xlu0 %3441, %v1411_v61   ;;  %v3467_v0 = vld [vmem:[#allocation11 + $0x20] sm:$0xff]   ;;  %1475 = vperm.xlu1 %3442, %v1409_v63   ;;  %v3462_v2 = vld [vmem:[#allocation5 + $0x8] sm:$0xff]   ;;  %v3465_v4 = vld [vmem:[#allocation5 + $0x10] sm:$0xff]  }
  0xb9   : > { %v1410_v3 = vld [vmem:[%s4692_s16 + $0x68] sm:$0xff]  ;;  %v1407_v5 = vld [vmem:[%s4692_s16 + $0x50] sm:$0xff]  ;;  %v1408_v6 = vld [vmem:[%s4692_s16 + $0x58] sm:$0xff] }
  0xba   : > { %v3447_v43 = vld [vmem:[#allocation4 + $0x30] sm:$0xff]   ;;  %3154 = vmatpush3.bf16.msra.mxu0 %v3448_v31  ;;  %v3449_v46 = vld [vmem:[#allocation4 + $0x28] sm:$0xff]   ;;  %v1405_v9 = vld [vmem:[%s4692_s16 + $0x40] sm:$0xff] }
  0xbb   : > { %v3445_v40 = vld [vmem:[#allocation4 + $0x38] sm:$0xff]   ;;  %3155 = vmatprep.subr.bf16.mxu0 %v3450_v38  ;;  %v3451_v50 = vld [vmem:[#allocation4 + $0x20] sm:$0xff]   ;;  %v3468_v7 = vld [vmem:[#allocation11 + $0x28] sm:$0xff]  }
  0xbc   : > { %3179 = vmatprep.subr.bf16.mxu1 %v3445_v40  ;;  %v3453_v55 = vld [vmem:[#allocation4 + $0x18] sm:$0xff]   ;;  %v3457_v59 = vld [vmem:[#allocation4 + $0x8] sm:$0xff]   ;;  %1490 = vperm.xlu0 %3441, %v1412_v1   ;;  %v3471_v8 = vld [vmem:[#allocation11 + $0x30] sm:$0xff]  }
  0xbd   : > { %3180 = vmatpush3.bf16.msra.mxu1 %v3445_v40  ;;  %1480 = vperm.xlu1 %3442, %v1410_v3   ;;  %v1406_v10 = vld [vmem:[%s4692_s16 + $0x48] sm:$0xff]  ;;  %v3466_v11 = vld [vmem:[#allocation5 + $0x18] sm:$0xff]   ;;  %v3469_v12 = vld [vmem:[#allocation5 + $0x20] sm:$0xff]  }
  0xbe   : > { %3181 = vmatprep.subr.bf16.mxu1 %v3447_v43  ;;  %3156 = vmatpush3.bf16.msra.mxu0 %v3450_v38  ;;  %v3460_v60 = vld [vmem:[#allocation4] sm:$0xff]   ;;  %v1403_v13 = vld [vmem:[%s4692_s16 + $0x30] sm:$0xff]  ;;  %v1404_v14 = vld [vmem:[%s4692_s16 + $0x38] sm:$0xff] }
  0xbf   : > { %3157 = vmatprep.subr.bf16.mxu0 %v3452_v44  ;;  %v3472_v15 = vld [vmem:[#allocation11 + $0x38] sm:$0xff]   ;;  %v1401_v16 = vld [vmem:[%s4692_s16 + $0x20] sm:$0xff]  ;;  %v1402_v17 = vld [vmem:[%s4692_s16 + $0x28] sm:$0xff] }
  0xc0   : > { %1465 = vperm.xlu0 %3441, %v1407_v5   ;;  %v3470_v18 = vld [vmem:[#allocation5 + $0x28] sm:$0xff]   ;;  %v3473_v21 = vld [vmem:[#allocation5 + $0x30] sm:$0xff]   ;;  %v1400_v25 = vld [vmem:[%s4692_s16 + $0x18] sm:$0xff] }
  0xc1   : > { %3182 = vmatpush3.bf16.msra.mxu1 %v3447_v43  ;;  %1470 = vperm.xlu1 %3442, %v1408_v6   ;;  %v1399_v22 = vld [vmem:[%s4692_s16 + $0x10] sm:$0xff]  ;;  %v1397_v28 = vld [vmem:[%s4692_s16] sm:$0xff]  ;;  %v1398_v31 = vld [vmem:[%s4692_s16 + $0x8] sm:$0xff] }
  0xc2   : > { %3183 = vmatprep.subr.bf16.mxu1 %v3449_v46  ;;  %3158 = vmatpush3.bf16.msra.mxu0 %v3452_v44  ;;  %v3474_v32 = vld [vmem:[#allocation5 + $0x38] sm:$0xff]   ;;  %v3475_v35 = vld [vmem:[#allocation9] sm:$0xff]   ;;  %v3484_v39 = vld [vmem:[%s4053_s28 + $0x30] sm:$0xff]  }
  0xc3   : > { %3159 = vmatprep.subr.bf16.mxu0 %v3454_v48  ;;  %v3483_v38 = vld [vmem:[%s4053_s28 + $0x38] sm:$0xff]   ;;  %v3485_v40 = vld [vmem:[%s4053_s28 + $0x28] sm:$0xff]   ;;  %v3486_v43 = vld [vmem:[%s4053_s28 + $0x20] sm:$0xff]  }
  0xc4   : > { %1455 = vperm.xlu0 %3441, %v1405_v9   ;;  %v3487_v44 = vld [vmem:[%s4053_s28 + $0x18] sm:$0xff]  }
  0xc5   : > { %3184 = vmatpush3.bf16.msra.mxu1 %v3449_v46  ;;  %1460 = vperm.xlu1 %3442, %v1406_v10  }
  0xc6   : > { %3185 = vmatprep.subr.bf16.mxu1 %v3451_v50  ;;  %3160 = vmatpush3.bf16.msra.mxu0 %v3454_v48 }
  0xc7   : > { %3161 = vmatprep.subr.bf16.mxu0 %v3456_v54 }
  0xc8   : > { %1445 = vperm.xlu0 %3441, %v1403_v13  }
  0xc9   : > { %3186 = vmatpush3.bf16.msra.mxu1 %v3451_v50  ;;  %1450 = vperm.xlu1 %3442, %v1404_v14  }
  0xca   : > { %3187 = vmatprep.subr.bf16.mxu1 %v3453_v55  ;;  %3162 = vmatpush3.bf16.msra.mxu0 %v3456_v54 }
  0xcc   : > { %1435 = vperm.xlu0 %3441, %v1401_v16  }
  0xcd   : > { %3188 = vmatpush3.bf16.msra.mxu1 %v3453_v55  ;;  %3164 = vmatmul.mubr.bf16.vlgmr.msra.gmra.mxu0 %v3459_v57 }
  0xce   : > { %3189 = vmatprep.subr.bf16.mxu1 %v3455_v56  ;;  %3167 = vmatprep.mubr.bf16.mxu0 %v3463_v58 }
  0xcf   : > { %1440 = vperm.xlu1 %3442, %v1402_v17  }
  0xd0   : > { %1425 = vperm.xlu0 %3441, %v1399_v22  }
  0xd1   : > { %3190 = vmatpush3.bf16.msra.mxu1 %v3455_v56 }
  0xd2   : > { %3191 = vmatprep.subr.bf16.mxu1 %v3457_v59 }
  0xd3   : > { %1430 = vperm.xlu1 %3442, %v1400_v25  }
  0xd4   : > { %1415 = vperm.xlu0 %3441, %v1397_v28  }
  0xd5   : > { %3192 = vmatpush3.bf16.msra.mxu1 %v3457_v59  ;;  %3168 = vmatmul.mubr.bf16.gmra.mxu0 %v3464_v62 }
  0xd6   : > { %3193 = vmatprep.subr.bf16.mxu1 %v3460_v60  ;;  %3171 = vmatprep.mubr.bf16.mxu0 %v3467_v0 }
  0xd7   : > { %1420 = vperm.xlu1 %3442, %v1398_v31  }
  0xd9   : > { %3194 = vmatpush3.bf16.msra.mxu1 %v3460_v60 }
  0xda   : > { %3243 = vmatprep.subr.bf16.mxu1 %v3483_v38 }
  0xdc   : > { %3196 = vmatmul.mubr.bf16.vlgmr.msra.gmra.mxu1 %v3462_v2 }
  0xdd   : > { %3199 = vmatprep.mubr.bf16.mxu1 %v3465_v4  ;;  %3172 = vmatmul.mubr.bf16.gmra.mxu0 %v3468_v7 }
  0xde   : > { %3175 = vmatprep.mubr.bf16.mxu0 %v3471_v8  ;;  %3244 = vmatpush3.bf16.msra.mxu1 %v3483_v38 }
  0xdf   : > { %3245 = vmatprep.subr.bf16.mxu1 %v3484_v39 }
  0xe2   : > { %3246 = vmatpush3.bf16.msra.mxu1 %v3484_v39 }
  0xe3   : > { %3247 = vmatprep.subr.bf16.mxu1 %v3485_v40 }
  0xe4   : > { %3200 = vmatmul.mubr.bf16.gmra.mxu1 %v3466_v11 }
  0xe5   : > { %3203 = vmatprep.mubr.bf16.mxu1 %v3469_v12  ;;  %3176 = vmatmul.mubr.bf16.gmra.mxu0 %v3472_v15 }
  0xe6   : > { %3227 = vmatprep.mubr.bf16.mxu0 %v3475_v35  ;;  %3248 = vmatpush3.bf16.msra.mxu1 %v3485_v40 }
  0xe7   : > { %3249 = vmatprep.subr.bf16.mxu1 %v3486_v43 }
  0xea   : > { %3250 = vmatpush3.bf16.msra.mxu1 %v3486_v43 }
  0xeb   : > { %3251 = vmatprep.subr.bf16.mxu1 %v3487_v44 }
  0xec   : > { %3204 = vmatmul.mubr.bf16.gmra.mxu1 %v3470_v18 }
  0xed   : > { %3207 = vmatprep.mubr.bf16.mxu1 %v3473_v21 }
  0xee   : > { %3252 = vmatpush3.bf16.msra.mxu1 %v3487_v44 }
  0xf4   : > { %3208 = vmatmul.mubr.bf16.gmra.mxu1 %v3474_v32 }
 0x133   : > { %v1476_v0 = vpop.permute.xlu1 %1475  ;;  %v1486_v2 = vpop.permute.xlu0 %1485 }
 0x137   : > { %v1491_v9 = vpop.permute.xlu0 %1490 }
 0x138   : > { %v1481_v6 = vpop.permute.xlu1 %1480 }
 0x13b   : > { %v1466_v15 = vpop.permute.xlu0 %1465 }
 0x13c   : > { %v1471_v13 = vpop.permute.xlu1 %1470 }
 0x13f   : > { %v1456_v19 = vpop.permute.xlu0 %1455 }
 0x140   : > { %v1461_v28 = vpop.permute.xlu1 %1460 }
 0x18d   : > { %v4247_v45 = vpop.f32.mrf.mxu0 }
 0x18f   : > { %v4249_v46 = vpop.f32.mrf.mxu0 }
 0x191   : > { %v4251_v47 = vpop.f32.mrf.mxu0 }
 0x193   : > { %v4253_v48 = vpop.f32.mrf.mxu0 }
 0x195   : > { %v4255_v50 = vpop.f32.mrf.mxu0 }
 0x197   : > { %v4257_v52 = vpop.f32.mrf.mxu0 }
 0x199   : > { %v3170_v54 = vpop.f32.mrf.mxu0 }
 0x19b   : > { %v4263_v56 = vpop.f32.mrf.mxu0 }
 0x19c   : > { %v4259_v53 = vpop.f32.mrf.mxu1 }
 0x19d   : > { %v3173_v58 = vpop.f32.mrf.mxu0 }
 0x19e   : > { %v4261_v55 = vpop.f32.mrf.mxu1 }
 0x19f   : > { %v1157_v60 = vpop.f32.mrf.mxu0 }
 0x1a0   : > { %v4265_v57 = vpop.f32.mrf.mxu1 }
 0x1a1   : > { %v3174_v63 = vpop.f32.mrf.mxu0 }
 0x1a2   : > { %v4267_v59 = vpop.f32.mrf.mxu1 }
 0x1a3   : > { %v1160_v4 = vpop.f32.mrf.mxu0 }
 0x1a4   : > { %v3201_v61 = vpop.f32.mrf.mxu1 }
 0x1a5   : > { %v3177_v7 = vpop.f32.mrf.mxu0 }
 0x1a6   : > { %v4269_v62 = vpop.f32.mrf.mxu1 }
 0x1a7   : > { %v1173_v11 = vpop.f32.mrf.mxu0 }
 0x1a8   : > { %v3202_v1 = vpop.f32.mrf.mxu1 }
 0x1a9   : > { %v3178_v17 = vpop.f32.mrf.mxu0 }
 0x1aa   : > { %v1337_v3 = vpop.f32.mrf.mxu1 }
 0x1ab   : > { %v1176_v38 = vpop.f32.mrf.mxu0 }
 0x1ac   : > { %v3205_v5 = vpop.f32.mrf.mxu1 }
 0x1ad   : > { %v1359_v35 = vadd.f32 %v3205_v5, %v3173_v58 }
 0x1ae   : > { %v1350_v8 = vpop.f32.mrf.mxu1 }
 0x1af   : > { %v1351_v30 = vadd.f32 %v1350_v8, %v1157_v60 }
 0x1b0   : > { %v3206_v10 = vpop.f32.mrf.mxu1 }
 0x1b1   : > { %v1362_v22 = vadd.f32 %v3206_v10, %v3174_v63 }
 0x1b2   : > { %v1353_v12 = vpop.f32.mrf.mxu1 }
 0x1b3   : > { %v1392_v24 = vmax.f32 %v1362_v22, 0.0  ;;  %v1354_v23 = vadd.f32 %v1353_v12, %v1160_v4  ;;  %v1389_v4 = vmax.f32 %v1351_v30, 0.0 }
 0x1b4   : > { %v3209_v14 = vpop.f32.mrf.mxu1 }
 0x1b5   : > { %v1375_v16 = vadd.f32 %v3209_v14, %v3177_v7  ;;  %v1391_v14 = vmax.f32 %v1359_v35, 0.0  ;;  %v1390_v58 = vmax.f32 %v1354_v23, 0.0  ;;  %v1335_v23 = vadd.f32 %v4269_v62, %v4257_v52 }
 0x1b6   : > { %v1366_v18 = vpop.f32.mrf.mxu1 }
 0x1b7   : > { %v1367_v21 = vadd.f32 %v1366_v18, %v1173_v11  ;;  %v1395_v31 = vmax.f32 %v1375_v16, 0.0  ;;  %v1451_v18 = vpop.permute.xlu1 %1450  ;;  %v1346_v16 = vadd.f32 %v3202_v1, %v3170_v54  ;;  %v1503_v22 = vmul.f32 %v1466_v15, %v1391_v14  ;;  %v3481_v14 = vld [vmem:[#allocation9 + $0x30] sm:$0xff]  }
 0x1b8   : > { %v3210_v25 = vpop.f32.mrf.mxu1  ;;  %v1502_v60 = vmul.f32 %v1461_v28, %v1390_v58 }
 0x1b9   : > { %v1378_v32 = vadd.f32 %v3210_v25, %v3178_v17  ;;  %v1393_v40 = vmax.f32 %v1367_v21, 0.0  ;;  %v1507_v20 = vmul.f32 %v1486_v2, %v1395_v31  ;;  %v1504_v17 = vmul.f32 %v1471_v13, %v1392_v24  ;;  %v1446_v21 = vpop.permute.xlu0 %1445 }
 0x1ba   : > { %v1369_v39 = vpop.f32.mrf.mxu1  ;;  %v1343_v25 = vadd.f32 %v3201_v61, %v4255_v50  ;;  %v1388_v2 = vmax.f32 %v1346_v16, 0.0  ;;  %v1501_v24 = vmul.f32 %v1456_v19, %v1389_v4  ;;  %v1330_v50 = vadd.f32 %v4265_v57, %v4251_v47 }
 0x1bb   : > { %v1396_v43 = vmax.f32 %v1378_v32, 0.0  ;;  %v1370_v44 = vadd.f32 %v1369_v39, %v1176_v38  ;;  %v1505_v11 = vmul.f32 %v1476_v0, %v1393_v40  ;;  %v1546_v0 = vpack.c.bf16 %v1504_v17, %v1503_v22 }
 0x1bc   : > { %v1500_v54 = vmul.f32 %v1451_v18, %v1388_v2  ;;  %v1545_v61 = vpack.c.bf16 %v1502_v60, %v1501_v24  ;;  %v1384_v12 = vmax.f32 %v1330_v50, 0.0  ;;  %v1322_v19 = vadd.f32 %v4267_v59, %v4253_v48  ;;  %v3490_v18 = vld [vmem:[%s4053_s28] sm:$0xff]  }
 0x1bd   : > { %v1508_v26 = vmul.f32 %v1491_v9, %v1396_v43  ;;  %v1394_v7 = vmax.f32 %v1370_v44, 0.0  ;;  %v1338_v9 = vadd.f32 %v1337_v3, %v4263_v56  ;;  %v1327_v56 = vadd.f32 %v4259_v53, %v4247_v45  ;;  %v3478_v43 = vld [vmem:[#allocation9 + $0x18] sm:$0xff]   ;;  %v3479_v44 = vld [vmem:[#allocation9 + $0x20] sm:$0xff]  }
 0x1be   : > { %v1385_v3 = vmax.f32 %v1335_v23, 0.0  ;;  %v1319_v57 = vadd.f32 %v4261_v55, %v4249_v46  ;;  %v1382_v45 = vmax.f32 %v1322_v19, 0.0  ;;  %v3476_v46 = vld [vmem:[#allocation9 + $0x8] sm:$0xff]   ;;  %v3477_v55 = vld [vmem:[#allocation9 + $0x10] sm:$0xff]   ;;  %v1812_v17 = vstv %s1795_s12 }
 0x1bf   : > { %v1506_v63 = vmul.f32 %v1481_v6, %v1394_v7  ;;  %v1548_v10 = vpack.c.bf16 %v1508_v26, %v1507_v20  ;;  %v1441_v6 = vpop.permute.xlu1 %1440  ;;  %v1387_v20 = vmax.f32 %v1343_v25, 0.0  ;;  %v1436_v26 = vpop.permute.xlu0 %1435  ;;  %v1386_v30 = vmax.f32 %v1338_v9, 0.0  ;;  %v3480_v7 = vld [vmem:[#allocation9 + $0x28] sm:$0xff]  }
 0x1c0   : > { %v1383_v47 = vmax.f32 %v1327_v56, 0.0  ;;  %v1497_v15 = vmul.f32 %v1436_v26, %v1385_v3  ;;  %v1381_v35 = vmax.f32 %v1319_v57, 0.0  ;;  %v1814_v25 = vmul.f32 %v1812_v17, %v4189_v51 }
 0x1c1   : > { %3211 = vmatprep.subr.bf16.mxu0 %v1548_v10  ;;  %v1547_v5 = vpack.c.bf16 %v1506_v63, %v1505_v11  ;;  %v1499_v1 = vmul.f32 %v1446_v21, %v1387_v20  ;;  %v1498_v52 = vmul.f32 %v1441_v6, %v1386_v30  ;;  %v3482_v11 = vld [vmem:[#allocation9 + $0x38] sm:$0xff]   ;;  %v3488_v63 = vld [vmem:[%s4053_s28 + $0x10] sm:$0xff]   ;;  %v1813_v21 = vmul.f32 %v1812_v17, %v4187_v49 }
 0x1c2   : > { %3212 = vmatpush3.bf16.msra.mxu0 %v1548_v10  ;;  %3253 = vmatprep.subr.bf16.mxu1 %v3488_v63  ;;  %v3489_v10 = vld [vmem:[%s4053_s28 + $0x8] sm:$0xff]   ;;  %v1815_v22 = vmul.f32 %v1812_v17, %v4179_v41  ;;  %v1820_v50 = vmul.f32 %v1812_v17, %v4168_v34  ;;  %v1818_v49 = vmul.f32 %v1812_v17, %v4174_v37 }
 0x1c3   : > { %3213 = vmatprep.subr.bf16.mxu0 %v1547_v5  ;;  %v1431_v8 = vpop.permute.xlu1 %1430  ;;  %v1544_v62 = vpack.c.bf16 %v1500_v54, %v1499_v1  ;;  %v1426_v13 = vpop.permute.xlu0 %1425  ;;  %v1543_v53 = vpack.c.bf16 %v1498_v52, %v1497_v15  ;;  %3254 = vmatpush3.bf16.msra.mxu1 %v3488_v63  ;;  %v1819_v51 = vmul.f32 %v1812_v17, %v4166_v33  ;;  %v4693_v52 = vld [vmem:[#allocation34_spill] sm:$0xff] }
 0x1c4   : > { %v1496_v28 = vmul.f32 %v1431_v8, %v1384_v12  ;;  %v1495_v32 = vmul.f32 %v1426_v13, %v1383_v47  ;;  %3255 = vmatprep.subr.bf16.mxu1 %v3489_v10  ;;  %v1824_v34 = vmul.f32 %v1812_v17, %v4155_v27  ;;  %v1822_v37 = vmul.f32 %v1812_v17, %v4693_v52 }
 0x1c6   : > { %3214 = vmatpush3.bf16.msra.mxu0 %v1547_v5  ;;  %v1542_v48 = vpack.c.bf16 %v1496_v28, %v1495_v32  ;;  %v1816_v5 = vmul.f32 %v1812_v17, %v4181_v42  ;;  %v1817_v42 = vmul.f32 %v1812_v17, %v4172_v36  ;;  %v1821_v36 = vmul.f32 %v1812_v17, %v4159_v29 }
 0x1c7   : > { %3215 = vmatprep.subr.bf16.mxu0 %v1546_v0  ;;  %v1421_v31 = vpop.permute.xlu1 %1420  ;;  %v1416_v38 = vpop.permute.xlu0 %1415  ;;  %3256 = vmatpush3.bf16.msra.mxu1 %v3489_v10 }
 0x1c8   : > { %v1494_v59 = vmul.f32 %v1421_v31, %v1382_v45  ;;  %v1493_v39 = vmul.f32 %v1416_v38, %v1381_v35  ;;  %3257 = vmatprep.subr.bf16.mxu1 %v3490_v18  ;;  %v4695_v38 = vld [vmem:[#allocation30_spill] sm:$0xff] }
 0x1c9   : > { %v1828_v27 = vmul.f32 %v1812_v17, %v4695_v38 }
 0x1ca   : > { %3216 = vmatpush3.bf16.msra.mxu0 %v1546_v0  ;;  %v1541_v40 = vpack.c.bf16 %v1494_v59, %v1493_v39  ;;  %v4697_v59 = vld [vmem:[#allocation32_spill] sm:$0xff] }
 0x1cb   : > { %3217 = vmatprep.subr.bf16.mxu0 %v1545_v61  ;;  %3258 = vmatpush3.bf16.msra.mxu1 %v3490_v18  ;;  %v1826_v39 = vmul.f32 %v1812_v17, %v4697_v59  ;;  %v3491_v18 = vld [vmem:[%s4055_s4 + $0x38] sm:$0xff]  }
 0x1cc   : > { %3307 = vmatprep.subr.bf16.mxu1 %v3491_v18 }
 0x1ce   : > { %3218 = vmatpush3.bf16.msra.mxu0 %v1545_v61 }
 0x1cf   : > { %3219 = vmatprep.subr.bf16.mxu0 %v1544_v62 }
 0x1d2   : > { %3220 = vmatpush3.bf16.msra.mxu0 %v1544_v62  ;;  %v4694_v62 = vld [vmem:[#allocation33_spill] sm:$0xff] }
 0x1d3   : > { %3221 = vmatprep.subr.bf16.mxu0 %v1543_v53  ;;  %v1823_v33 = vmul.f32 %v1812_v17, %v4694_v62 }
 0x1d6   : > { %3222 = vmatpush3.bf16.msra.mxu0 %v1543_v53 }
 0x1d7   : > { %3223 = vmatprep.subr.bf16.mxu0 %v1542_v48 }
 0x1da   : > { %3224 = vmatpush3.bf16.msra.mxu0 %v1542_v48  ;;  %v4696_v48 = vld [vmem:[#allocation31_spill] sm:$0xff] }
 0x1db   : > { %3225 = vmatprep.subr.bf16.mxu0 %v1541_v40  ;;  %v1825_v29 = vmul.f32 %v1812_v17, %v4696_v48 }
 0x1de   : > { %3226 = vmatpush3.bf16.msra.mxu0 %v1541_v40  ;;  %v4698_v40 = vld [vmem:[#allocation29_spill] sm:$0xff] }
 0x1df   : > { %3275 = vmatprep.subr.bf16.mxu0 %v3491_v18 }
 0x1e1   : > { %3228 = vmatmul.mubr.bf16.vlgmr.msra.gmra.mxu0 %v3476_v46  ;;  %v1827_v46 = vmul.f32 %v1812_v17, %v4698_v40  ;;  %v3493_v17 = vld [vmem:[%s4055_s4 + $0x28] sm:$0xff]  }
 0x1e2   : > { %3231 = vmatprep.mubr.bf16.mxu0 %v3477_v55  ;;  %3276 = vmatpush3.bf16.msra.mxu0 %v3491_v18 }
 0x1e9   : > { %3232 = vmatmul.mubr.bf16.gmra.mxu0 %v3478_v43 }
 0x1ea   : > { %3235 = vmatprep.mubr.bf16.mxu0 %v3479_v44 }
 0x1f1   : > { %3236 = vmatmul.mubr.bf16.gmra.mxu0 %v3480_v7 }
 0x1f2   : > { %3239 = vmatprep.mubr.bf16.mxu0 %v3481_v14 }
 0x1f9   : > { %3240 = vmatmul.mubr.bf16.gmra.mxu0 %v3482_v11 }
 0x2a1   : > { %v3229_v16 = vpop.f32.mrf.mxu0 }
 0x2a2   : > { %v1847_v6 = vadd.f32 %v3229_v16, %v1815_v22  ;;  %v3492_v16 = vld [vmem:[%s4055_s4 + $0x30] sm:$0xff]   ;;  %v3497_v22 = vld [vmem:[%s4055_s4 + $0x8] sm:$0xff]  }
 0x2a3   : > { %v1631_v58 = vpop.f32.mrf.mxu0  ;;  %3277 = vmatprep.subr.bf16.mxu0 %v3492_v16 }
 0x2a4   : > { %v1845_v60 = vadd.f32 %v1813_v21, %v1631_v58  ;;  %3278 = vmatpush3.bf16.msra.mxu0 %v3492_v16  ;;  %v3494_v58 = vld [vmem:[%s4055_s4 + $0x20] sm:$0xff]   ;;  %v3496_v21 = vld [vmem:[%s4055_s4 + $0x10] sm:$0xff]  }
 0x2a5   : > { %v3230_v4 = vpop.f32.mrf.mxu0  ;;  %3279 = vmatprep.subr.bf16.mxu0 %v3493_v17 }
 0x2a6   : > { %v1848_v2 = vadd.f32 %v3230_v4, %v1816_v5  ;;  %v3495_v5 = vld [vmem:[%s4055_s4 + $0x18] sm:$0xff]   ;;  %v3498_v4 = vld [vmem:[%s4055_s4] sm:$0xff]  }
 0x2a7   : > { %v1634_v9 = vpop.f32.mrf.mxu0 }
 0x2a8   : > { %v1846_v0 = vadd.f32 %v1814_v25, %v1634_v9  ;;  %v1862_v24 = vpack.c.bf16 %v1848_v2, %v1847_v6  ;;  %3280 = vmatpush3.bf16.msra.mxu0 %v3493_v17  ;;  %v2972_v9 = vld [vmem:[%s4699_s29] ss:$0 sm:$0xff] }
 0x2a9   : > { %v3233_v20 = vpop.f32.mrf.mxu0  ;;  %3281 = vmatprep.subr.bf16.mxu0 %v3494_v58 }
 0x2aa   : > { %v1861_v23 = vpack.c.bf16 %v1846_v0, %v1845_v60  ;;  %v1851_v1 = vadd.f32 %v3233_v20, %v1819_v51 }
 0x2ab   : > { %v1647_v26 = vpop.f32.mrf.mxu0 }
 0x2ac   : > { %3259 = vmatprep.mubr.bf16.mxu1 %v1861_v23  ;;  %v1849_v61 = vadd.f32 %v1817_v42, %v1647_v26  ;;  %3282 = vmatpush3.bf16.msra.mxu0 %v3494_v58 }
 0x2ad   : > { %v3234_v41 = vpop.f32.mrf.mxu0  ;;  %3260 = vmatmul.mubr.bf16.vlgmr.msra.gmra.mxu1 %v1862_v24  ;;  %3283 = vmatprep.subr.bf16.mxu0 %v3495_v5 }
 0x2ae   : > { %v1852_v54 = vadd.f32 %v3234_v41, %v1820_v50  ;;  %3315 = vmatpush3.bf16.msra.mxu1 %v3491_v18 }
 0x2af   : > { %v1650_v30 = vpop.f32.mrf.mxu0  ;;  %3308 = vmatprep.subr.bf16.mxu1 %v3492_v16 }
 0x2b0   : > { %v1850_v56 = vadd.f32 %v1818_v49, %v1650_v30  ;;  %v1864_v12 = vpack.c.bf16 %v1852_v54, %v1851_v1  ;;  %3284 = vmatpush3.bf16.msra.mxu0 %v3495_v5 }
 0x2b1   : > { %v3237_v3 = vpop.f32.mrf.mxu0  ;;  %3285 = vmatprep.subr.bf16.mxu0 %v3496_v21 }
 0x2b2   : > { %v1863_v8 = vpack.c.bf16 %v1850_v56, %v1849_v61  ;;  %v1855_v45 = vadd.f32 %v3237_v3, %v1823_v33  ;;  %3316 = vmatpush3.bf16.msra.mxu1 %v3492_v16 }
 0x2b3   : > { %v1663_v19 = vpop.f32.mrf.mxu0  ;;  %3309 = vmatprep.subr.bf16.mxu1 %v3493_v17 }
 0x2b4   : > { %3263 = vmatprep.mubr.bf16.mxu1 %v1863_v8  ;;  %v1853_v15 = vadd.f32 %v1821_v36, %v1663_v19  ;;  %3286 = vmatpush3.bf16.msra.mxu0 %v3496_v21 }
 0x2b5   : > { %v3238_v13 = vpop.f32.mrf.mxu0  ;;  %3264 = vmatmul.mubr.bf16.gmra.mxu1 %v1864_v12  ;;  %3287 = vmatprep.subr.bf16.mxu0 %v3497_v22 }
 0x2b6   : > { %v1856_v47 = vadd.f32 %v3238_v13, %v1824_v34  ;;  %3317 = vmatpush3.bf16.msra.mxu1 %v3493_v17 }
 0x2b7   : > { %v1666_v57 = vpop.f32.mrf.mxu0  ;;  %3310 = vmatprep.subr.bf16.mxu1 %v3494_v58 }
 0x2b8   : > { %v1854_v28 = vadd.f32 %v1822_v37, %v1666_v57  ;;  %v1866_v32 = vpack.c.bf16 %v1856_v47, %v1855_v45  ;;  %3288 = vmatpush3.bf16.msra.mxu0 %v3497_v22 }
 0x2b9   : > { %v3241_v53 = vpop.f32.mrf.mxu0  ;;  %3289 = vmatprep.subr.bf16.mxu0 %v3498_v4 }
 0x2ba   : > { %v1865_v31 = vpack.c.bf16 %v1854_v28, %v1853_v15  ;;  %v1859_v11 = vadd.f32 %v3241_v53, %v1827_v46  ;;  %3318 = vmatpush3.bf16.msra.mxu1 %v3494_v58 }
 0x2bb   : > { %v1679_v35 = vpop.f32.mrf.mxu0  ;;  %3311 = vmatprep.subr.bf16.mxu1 %v3495_v5 }
 0x2bc   : > { %3267 = vmatprep.mubr.bf16.mxu1 %v1865_v31  ;;  %v1857_v7 = vadd.f32 %v1825_v29, %v1679_v35  ;;  %3290 = vmatpush3.bf16.msra.mxu0 %v3498_v4 }
 0x2bd   : > { %v3242_v55 = vpop.f32.mrf.mxu0  ;;  %3268 = vmatmul.mubr.bf16.gmra.mxu1 %v1866_v32 }
 0x2be   : > { %v1860_v43 = vadd.f32 %v3242_v55, %v1828_v27  ;;  %3319 = vmatpush3.bf16.msra.mxu1 %v3495_v5 }
 0x2bf   : > { %v1682_v44 = vpop.f32.mrf.mxu0  ;;  %3312 = vmatprep.subr.bf16.mxu1 %v3496_v21 }
 0x2c0   : > { %v1858_v14 = vadd.f32 %v1826_v39, %v1682_v44  ;;  %v1868_v10 = vpack.c.bf16 %v1860_v43, %v1859_v11 }
 0x2c2   : > { %v1867_v63 = vpack.c.bf16 %v1858_v14, %v1857_v7  ;;  %3320 = vmatpush3.bf16.msra.mxu1 %v3496_v21 }
 0x2c3   : > { %3313 = vmatprep.subr.bf16.mxu1 %v3497_v22 }
 0x2c4   : > { %3271 = vmatprep.mubr.bf16.mxu1 %v1867_v63 }
 0x2c5   : > { %3272 = vmatmul.mubr.bf16.gmra.mxu1 %v1868_v10 }
 0x2c6   : > { %3321 = vmatpush3.bf16.msra.mxu1 %v3497_v22 }
 0x2c7   : > { %3314 = vmatprep.subr.bf16.mxu1 %v3498_v4 }
 0x2ca   : > { %3322 = vmatpush3.bf16.msra.mxu1 %v3498_v4 }
 0x36d   : > { %v3261_v25 = vpop.f32.mrf.mxu1 }
 0x36e   : > { %v4316_v6 = vadd.f32 %v3261_v25, %v2972_v9 }
 0x36f   : > { %v1974_v2 = vpop.f32.mrf.mxu1 }
 0x370   : > { %v4320_v24 = vadd.f32 %v2972_v9, %v1974_v2  ;;  %v2039_v49 = vmul.f32 0.0, %v4316_v6 }
 0x371   : > { %v3262_v60 = vpop.f32.mrf.mxu1 }
 0x372   : > { %v4322_v26 = vadd.f32 %v3262_v60, %v2972_v9 }
 0x373   : > { %v1977_v0 = vpop.f32.mrf.mxu1 }
 0x374   : > { %v4318_v20 = vadd.f32 %v2972_v9, %v1977_v0  ;;  %v2040_v30 = vmul.f32 0.0, %v4322_v26 }
 0x375   : > { %v3265_v23 = vpop.f32.mrf.mxu1 }
 0x376   : > { %v2038_v50 = vmul.f32 0.0, %v4318_v20  ;;  %v1999_v1 = vadd.f32 %v3265_v23, %v2972_v9 }
 0x377   : > { %v1990_v42 = vpop.f32.mrf.mxu1 }
 0x378   : > { %v2053_v51 = vadd.f32 %v2038_v50, %v4320_v24  ;;  %v1991_v41 = vadd.f32 %v2972_v9, %v1990_v42  ;;  %v2043_v62 = vmul.f32 0.0, %v1999_v1 }
 0x379   : > { %v3266_v54 = vpop.f32.mrf.mxu1 }
 0x37a   : > { %v2054_v61 = vadd.f32 %v2053_v51, %v2039_v49  ;;  %v2041_v3 = vmul.f32 0.0, %v1991_v41  ;;  %v2002_v36 = vadd.f32 %v3266_v54, %v2972_v9 }
 0x37b   : > { %v1993_v56 = vpop.f32.mrf.mxu1 }
 0x37c   : > { %v2055_v8 = vadd.f32 %v2054_v61, %v2040_v30  ;;  %v1994_v12 = vadd.f32 %v2972_v9, %v1993_v56  ;;  %v2044_v57 = vmul.f32 0.0, %v2002_v36 }
 0x37d   : > { %v3269_v19 = vpop.f32.mrf.mxu1 }
 0x37e   : > { %v2056_v34 = vadd.f32 %v2055_v8, %v2041_v3  ;;  %v2042_v52 = vmul.f32 0.0, %v1994_v12  ;;  %v2015_v45 = vadd.f32 %v3269_v19, %v2972_v9 }
 0x37f   : > { %v2006_v37 = vpop.f32.mrf.mxu1 }
 0x380   : > { %v2057_v33 = vadd.f32 %v2056_v34, %v2042_v52  ;;  %v2007_v13 = vadd.f32 %v2972_v9, %v2006_v37  ;;  %v2047_v59 = vmul.f32 0.0, %v2015_v45 }
 0x381   : > { %v3270_v47 = vpop.f32.mrf.mxu1 }
 0x382   : > { %v2058_v15 = vadd.f32 %v2057_v33, %v2043_v62  ;;  %v2045_v53 = vmul.f32 0.0, %v2007_v13  ;;  %v2018_v27 = vadd.f32 %v3270_v47, %v2972_v9 }
 0x383   : > { %v2009_v28 = vpop.f32.mrf.mxu1 }
 0x384   : > { %v2059_v31 = vadd.f32 %v2058_v15, %v2044_v57  ;;  %v2010_v32 = vadd.f32 %v2972_v9, %v2009_v28  ;;  %v2048_v55 = vmul.f32 0.0, %v2018_v27 }
 0x385   : > { %v3273_v35 = vpop.f32.mrf.mxu1 }
 0x386   : > { %v2060_v38 = vadd.f32 %v2059_v31, %v2045_v53  ;;  %v2046_v48 = vmul.f32 0.0, %v2010_v32  ;;  %v2031_v7 = vadd.f32 %v3273_v35, %v2972_v9 }
 0x387   : > { %v2022_v29 = vpop.f32.mrf.mxu1 }
 0x388   : > { %v2061_v39 = vadd.f32 %v2060_v38, %v2046_v48  ;;  %v2023_v40 = vadd.f32 %v2972_v9, %v2022_v29  ;;  %v2051_v17 = vmul.f32 0.0, %v2031_v7 }
 0x389   : > { %v3274_v46 = vpop.f32.mrf.mxu1 }
 0x38a   : > { %v2062_v43 = vadd.f32 %v2061_v39, %v2047_v59  ;;  %v2049_v14 = vmul.f32 0.0, %v2023_v40  ;;  %v2034_v18 = vadd.f32 %v3274_v46, %v2972_v9 }
 0x38b   : > { %v2025_v44 = vpop.f32.mrf.mxu1 }
 0x38c   : > { %v2063_v11 = vadd.f32 %v2062_v43, %v2048_v55  ;;  %v2026_v63 = vadd.f32 %v2972_v9, %v2025_v44  ;;  %v2052_v5 = vmul.f32 0.0, %v2034_v18 }
 0x38e   : > { %v2064_v10 = vadd.f32 %v2063_v11, %v2049_v14  ;;  %v2050_v16 = vmul.f32 0.0, %v2026_v63 }
 0x390   : > { %v2065_v58 = vadd.f32 %v2064_v10, %v2050_v16 }
 0x392   : > { %v2066_v21 = vadd.f32 %v2065_v58, %v2051_v17 }
 0x394   : > { %v2067_v25 = vadd.f32 %v2066_v21, %v2052_v5 }
 0x396   : > { %v2068_v22 = vrot.slane %v2067_v25, 4 }
 0x398   : > { %v2069_v4 = vadd.f32 %v2068_v22, %v2067_v25 }
 0x39a   : > { %v2070_v2 = vrot.slane %v2069_v4, 2 }
 0x39c   : > { %v2071_v60 = vadd.f32 %v2070_v2, %v2069_v4 }
 0x39e   : > { %v2072_v0 = vrot.slane %v2071_v60, 1 }
 0x3a0   : > { %v2073_v23 = vadd.f32 %v2072_v0, %v2071_v60 }
 0x3a2   : > { %v2074_v50 = vmul.f32 0.125, %v2073_v23 }
 0x3a4   : > { %v4329_v42 = vsub.f32 %v4318_v20, %v2074_v50  ;;  %v4332_v49 = vsub.f32 %v4316_v6, %v2074_v50  ;;  %v4337_v51 = vsub.f32 %v4320_v24, %v2074_v50  ;;  %v4340_v54 = vsub.f32 %v4322_v26, %v2074_v50 }
 0x3a5   : > { %v4342_v30 = vsub.f32 %v1991_v41, %v2074_v50  ;;  %v4346_v20 = vsub.f32 %v1994_v12, %v2074_v50  ;;  %v4352_v8 = vsub.f32 %v1999_v1, %v2074_v50  ;;  %v4356_v19 = vsub.f32 %v2002_v36, %v2074_v50 }
 0x3a6   : > { %v2092_v9 = vmul.f32 %v4329_v42, %v4329_v42  ;;  %v2093_v61 = vmul.f32 %v4332_v49, %v4332_v49  ;;  %v2091_v6 = vmul.f32 %v4337_v51, %v4337_v51  ;;  %v2094_v3 = vmul.f32 %v4340_v54, %v4340_v54 }
 0x3a7   : > { %v2095_v24 = vmul.f32 %v4342_v30, %v4342_v30  ;;  %v2096_v34 = vmul.f32 %v4346_v20, %v4346_v20  ;;  %v2083_v37 = vsub.f32 %v2007_v13, %v2074_v50  ;;  %v2097_v62 = vmul.f32 %v4352_v8, %v4352_v8 }
 0x3a8   : > { %v2108_v56 = vmul.f32 0.0, %v2092_v9  ;;  %v2109_v26 = vmul.f32 0.0, %v2093_v61  ;;  %v2110_v12 = vmul.f32 0.0, %v2094_v3  ;;  %v2084_v1 = vsub.f32 %v2010_v32, %v2074_v50 }
 0x3a9   : > { %v2111_v33 = vmul.f32 0.0, %v2095_v24  ;;  %v2098_v57 = vmul.f32 %v4356_v19, %v4356_v19  ;;  %v2112_v15 = vmul.f32 0.0, %v2096_v34  ;;  %v2085_v53 = vsub.f32 %v2015_v45, %v2074_v50 }
 0x3aa   : > { %v2123_v41 = vadd.f32 %v2108_v56, %v2091_v6  ;;  %v2099_v36 = vmul.f32 %v2083_v37, %v2083_v37  ;;  %v2113_v31 = vmul.f32 0.0, %v2097_v62  ;;  %v2086_v38 = vsub.f32 %v2018_v27, %v2074_v50 }
 0x3ab   : > { %v2100_v48 = vmul.f32 %v2084_v1, %v2084_v1  ;;  %v2114_v29 = vmul.f32 0.0, %v2098_v57  ;;  %v4364_v13 = vsub.f32 %v2023_v40, %v2074_v50  ;;  %v2101_v39 = vmul.f32 %v2085_v53, %v2085_v53 }
 0x3ac   : > { %v2124_v52 = vadd.f32 %v2123_v41, %v2109_v26  ;;  %v2115_v46 = vmul.f32 0.0, %v2099_v36  ;;  %v2088_v43 = vsub.f32 %v2026_v63, %v2074_v50  ;;  %v2102_v32 = vmul.f32 %v2086_v38, %v2086_v38  ;;  %v4381_v41 = vld [vmem:[%s4700_s5] ss:$0 sm:$0xff] }
 0x3ad   : > { %v2116_v44 = vmul.f32 0.0, %v2100_v48  ;;  %v4366_v11 = vsub.f32 %v2031_v7, %v2074_v50  ;;  %v2103_v45 = vmul.f32 %v4364_v13, %v4364_v13  ;;  %v2117_v10 = vmul.f32 0.0, %v2101_v39 }
 0x3ae   : > { %v2125_v47 = vadd.f32 %v2124_v52, %v2110_v12  ;;  %v4370_v27 = vsub.f32 %v2034_v18, %v2074_v50  ;;  %v2104_v17 = vmul.f32 %v2088_v43, %v2088_v43  ;;  %v2118_v58 = vmul.f32 0.0, %v2102_v32 }
 0x3af   : > { %v2105_v5 = vmul.f32 %v4366_v11, %v4366_v11  ;;  %v2119_v21 = vmul.f32 0.0, %v2103_v45 }
 0x3b0   : > { %v2126_v28 = vadd.f32 %v2125_v47, %v2111_v33  ;;  %v2106_v25 = vmul.f32 %v4370_v27, %v4370_v27  ;;  %v2120_v7 = vmul.f32 0.0, %v2104_v17  ;;  %v4390_v33 = vld [vmem:[%s767_s27] ss:$0 sm:$0xff] }
 0x3b1   : > { %v2121_v4 = vmul.f32 0.0, %v2105_v5 }
 0x3b2   : > { %v2127_v35 = vadd.f32 %v2126_v28, %v2112_v15  ;;  %v2122_v60 = vmul.f32 0.0, %v2106_v25 }
 0x3b4   : > { %v2128_v59 = vadd.f32 %v2127_v35, %v2113_v31 }
 0x3b6   : > { %v2129_v55 = vadd.f32 %v2128_v59, %v2114_v29 }
 0x3b8   : > { %v2130_v14 = vadd.f32 %v2129_v55, %v2115_v46 }
 0x3ba   : > { %v2131_v16 = vadd.f32 %v2130_v14, %v2116_v44 }
 0x3bc   : > { %v2132_v40 = vadd.f32 %v2131_v16, %v2117_v10 }
 0x3be   : > { %v2133_v63 = vadd.f32 %v2132_v40, %v2118_v58 }
 0x3c0   : > { %v2134_v22 = vadd.f32 %v2133_v63, %v2119_v21 }
 0x3c2   : > { %v2135_v2 = vadd.f32 %v2134_v22, %v2120_v7 }
 0x3c4   : > { %v2136_v0 = vadd.f32 %v2135_v2, %v2121_v4 }
 0x3c6   : > { %v2137_v18 = vadd.f32 %v2136_v0, %v2122_v60 }
 0x3c8   : > { %v2138_v23 = vrot.slane %v2137_v18, 4 }
 0x3ca   : > { %v2139_v50 = vadd.f32 %v2138_v23, %v2137_v18 }
 0x3cc   : > { %v2140_v9 = vrot.slane %v2139_v50, 2 }
 0x3ce   : > { %v2141_v61 = vadd.f32 %v2140_v9, %v2139_v50 }
 0x3d0   : > { %v2142_v56 = vrot.slane %v2141_v61, 1 }
 0x3d2   : > { %v2143_v6 = vadd.f32 %v2142_v56, %v2141_v61 }
 0x3d4   : > { %v2144_v3 = vmul.f32 0.125, %v2143_v6 }
 0x3d6   : > { %v2145_v24 = vadd.f32 1e-05, %v2144_v3 }
 0x3d8   : > { %3499 = vrsqrt.f32 %v2145_v24 }
 0x3e5   : > { %v3500_v26 = vpop.eup %3499 }
 0x3e6   : > { %v2158_v34 = vmul.f32 %v3500_v26, %v2086_v38  ;;  %v2160_v12 = vmul.f32 %v3500_v26, %v2088_v43  ;;  %v2147_v52 = vmul.f32 %v3500_v26, %v4337_v51  ;;  %v2148_v62 = vmul.f32 %v3500_v26, %v4329_v42 }
 0x3e7   : > { %v2155_v47 = vmul.f32 %v3500_v26, %v2083_v37  ;;  %v2156_v57 = vmul.f32 %v3500_v26, %v2084_v1  ;;  %v2149_v15 = vmul.f32 %v3500_v26, %v4332_v49  ;;  %v2150_v28 = vmul.f32 %v3500_v26, %v4340_v54 }
 0x3e8   : > { %v2183_v36 = vmul.f32 %v4381_v41, %v2160_v12  ;;  %v2170_v31 = vmul.f32 %v4381_v41, %v2147_v52  ;;  %v2171_v51 = vmul.f32 %v4381_v41, %v2148_v62  ;;  %v2157_v35 = vmul.f32 %v3500_v26, %v2085_v53 }
 0x3e9   : > { %v2178_v42 = vmul.f32 %v4381_v41, %v2155_v47  ;;  %v2179_v38 = vmul.f32 %v4381_v41, %v2156_v57  ;;  %v2172_v48 = vmul.f32 %v4381_v41, %v2149_v15  ;;  %v2173_v37 = vmul.f32 %v4381_v41, %v2150_v28 }
 0x3ea   : > { %v2193_v1 = vadd.f32 %v4390_v33, %v2170_v31  ;;  %v2194_v49 = vadd.f32 %v4390_v33, %v2171_v51  ;;  %v2180_v54 = vmul.f32 %v4381_v41, %v2157_v35  ;;  %v2181_v29 = vmul.f32 %v4381_v41, %v2158_v34 }
 0x3eb   : > { %v2201_v59 = vadd.f32 %v4390_v33, %v2178_v42  ;;  %v2202_v53 = vadd.f32 %v4390_v33, %v2179_v38  ;;  %v2195_v39 = vadd.f32 %v4390_v33, %v2172_v48  ;;  %v2196_v46 = vadd.f32 %v4390_v33, %v2173_v37  ;;  %v2983_v42 = vld [vmem:[%s770_s13] ss:$0 sm:$0xff] }
 0x3ec   : > { %v2209_v55 = vmax.f32 %v2193_v1, 0.0  ;;  %v2210_v43 = vmax.f32 %v2194_v49, 0.0  ;;  %v2203_v32 = vadd.f32 %v4390_v33, %v2180_v54  ;;  %v2204_v44 = vadd.f32 %v4390_v33, %v2181_v29 }
 0x3ed   : > { %v2217_v14 = vmax.f32 %v2201_v59, 0.0  ;;  %v2218_v45 = vmax.f32 %v2202_v53, 0.0  ;;  %v2211_v10 = vmax.f32 %v2195_v39, 0.0  ;;  %v2212_v16 = vmax.f32 %v2196_v46, 0.0 }
 0x3ee   : > { %v2225_v17 = vpack.c.bf16 %v2210_v43, %v2209_v55  ;;  %v2219_v58 = vmax.f32 %v2203_v32, 0.0  ;;  %v2220_v40 = vmax.f32 %v2204_v44, 0.0  ;;  %v2151_v5 = vmul.f32 %v3500_v26, %v4342_v30 }
 0x3ef   : > { %v2229_v21 = vpack.c.bf16 %v2218_v45, %v2217_v14  ;;  %v2226_v63 = vpack.c.bf16 %v2212_v16, %v2211_v10  ;;  %v2152_v25 = vmul.f32 %v3500_v26, %v4346_v20  ;;  %v2159_v7 = vmul.f32 %v3500_v26, %v4364_v13 }
 0x3f0   : > { %3291 = vmatprep.mubr.bf16.mxu0 %v2225_v17  ;;  %v2230_v22 = vpack.c.bf16 %v2220_v40, %v2219_v58  ;;  %v2174_v4 = vmul.f32 %v4381_v41, %v2151_v5  ;;  %v2206_v2 = vadd.f32 %v4390_v33, %v2183_v36  ;;  %v2153_v60 = vmul.f32 %v3500_v26, %v4352_v8 }
 0x3f1   : > { %3299 = vmatprep.mubr.bf16.mxu1 %v2229_v21  ;;  %3292 = vmatmul.mubr.bf16.vlgmr.msra.gmra.mxu0 %v2226_v63  ;;  %v2175_v0 = vmul.f32 %v4381_v41, %v2152_v25  ;;  %v2182_v30 = vmul.f32 %v4381_v41, %v2159_v7  ;;  %v2154_v18 = vmul.f32 %v3500_v26, %v4356_v19 }
 0x3f2   : > { %3300 = vmatmul.mubr.bf16.vlgmr.msra.gmra.mxu1 %v2230_v22  ;;  %v2197_v20 = vadd.f32 %v4390_v33, %v2174_v4  ;;  %v2222_v13 = vmax.f32 %v2206_v2, 0.0  ;;  %v2176_v23 = vmul.f32 %v4381_v41, %v2153_v60  ;;  %v2161_v50 = vmul.f32 %v3500_v26, %v4366_v11 }
 0x3f3   : > { %v2198_v9 = vadd.f32 %v4390_v33, %v2175_v0  ;;  %v2205_v8 = vadd.f32 %v4390_v33, %v2182_v30  ;;  %v2177_v61 = vmul.f32 %v4381_v41, %v2154_v18  ;;  %v2162_v56 = vmul.f32 %v3500_v26, %v4370_v27 }
 0x3f4   : > { %v2213_v6 = vmax.f32 %v2197_v20, 0.0  ;;  %v2199_v3 = vadd.f32 %v4390_v33, %v2176_v23  ;;  %v2184_v19 = vmul.f32 %v4381_v41, %v2161_v50 }
 0x3f5   : > { %v2214_v24 = vmax.f32 %v2198_v9, 0.0  ;;  %v2221_v34 = vmax.f32 %v2205_v8, 0.0  ;;  %v2200_v12 = vadd.f32 %v4390_v33, %v2177_v61  ;;  %v2185_v52 = vmul.f32 %v4381_v41, %v2162_v56 }
 0x3f6   : > { %v2215_v11 = vmax.f32 %v2199_v3, 0.0  ;;  %v2207_v62 = vadd.f32 %v4390_v33, %v2184_v19 }
 0x3f7   : > { %v2227_v47 = vpack.c.bf16 %v2214_v24, %v2213_v6  ;;  %v2231_v57 = vpack.c.bf16 %v2222_v13, %v2221_v34  ;;  %v2216_v15 = vmax.f32 %v2200_v12, 0.0  ;;  %v2208_v27 = vadd.f32 %v4390_v33, %v2185_v52 }
 0x3f8   : > { %v2223_v26 = vmax.f32 %v2207_v62, 0.0 }
 0x3f9   : > { %3295 = vmatprep.mubr.bf16.mxu0 %v2227_v47  ;;  %3303 = vmatprep.mubr.bf16.mxu1 %v2231_v57  ;;  %v2228_v28 = vpack.c.bf16 %v2216_v15, %v2215_v11  ;;  %v2224_v36 = vmax.f32 %v2208_v27, 0.0 }
 0x3fb   : > { %3296 = vmatmul.mubr.bf16.gmra.mxu0 %v2228_v28  ;;  %v2232_v31 = vpack.c.bf16 %v2224_v36, %v2223_v26 }
 0x3fd   : > { %3304 = vmatmul.mubr.bf16.gmra.mxu1 %v2232_v31 }
 0x4b1   : > { %v3293_v51 = vpop.f32.mrf.mxu0 }
 0x4b2   : > { %v3301_v35 = vpop.f32.mrf.mxu1  ;;  %v4438_v33 = vadd.f32 %v3293_v51, %v2983_v42 }
 0x4b3   : > { %v2338_v41 = vpop.f32.mrf.mxu0  ;;  %v2379_v20 = vadd.f32 %v3301_v35, %v2983_v42 }
 0x4b4   : > { %v2370_v38 = vpop.f32.mrf.mxu1  ;;  %v4440_v54 = vadd.f32 %v2983_v42, %v2338_v41  ;;  %v2403_v39 = vmul.f32 0.0, %v4438_v33 }
 0x4b5   : > { %v3294_v48 = vpop.f32.mrf.mxu0  ;;  %v2371_v22 = vadd.f32 %v2983_v42, %v2370_v38  ;;  %v2411_v56 = vmul.f32 0.0, %v2379_v20 }
 0x4b6   : > { %v3302_v49 = vpop.f32.mrf.mxu1  ;;  %v4442_v29 = vadd.f32 %v3294_v48, %v2983_v42 }
 0x4b7   : > { %v2341_v37 = vpop.f32.mrf.mxu0  ;;  %v2409_v13 = vmul.f32 0.0, %v2371_v22  ;;  %v2382_v50 = vadd.f32 %v3302_v49, %v2983_v42 }
 0x4b8   : > { %v2342_v1 = vadd.f32 %v2983_v42, %v2341_v37  ;;  %v2373_v55 = vpop.f32.mrf.mxu1  ;;  %v2404_v32 = vmul.f32 0.0, %v4442_v29 }
 0x4b9   : > { %v2374_v60 = vadd.f32 %v2983_v42, %v2373_v55  ;;  %v2412_v19 = vmul.f32 0.0, %v2382_v50 }
 0x4ba   : > { %v2402_v59 = vmul.f32 0.0, %v2342_v1 }
 0x4bb   : > { %v3297_v53 = vpop.f32.mrf.mxu0  ;;  %v2410_v9 = vmul.f32 0.0, %v2374_v60 }
 0x4bc   : > { %v2417_v46 = vadd.f32 %v2402_v59, %v4440_v54  ;;  %v2363_v40 = vadd.f32 %v3297_v53, %v2983_v42 }
 0x4bd   : > { %v2354_v43 = vpop.f32.mrf.mxu0  ;;  %v3305_v17 = vpop.f32.mrf.mxu1 }
 0x4be   : > { %v2418_v44 = vadd.f32 %v2417_v46, %v2403_v39  ;;  %v2355_v14 = vadd.f32 %v2983_v42, %v2354_v43  ;;  %v2407_v4 = vmul.f32 0.0, %v2363_v40  ;;  %v2395_v12 = vadd.f32 %v3305_v17, %v2983_v42 }
 0x4bf   : > { %v3298_v45 = vpop.f32.mrf.mxu0  ;;  %v2386_v7 = vpop.f32.mrf.mxu1 }
 0x4c0   : > { %v2405_v10 = vmul.f32 0.0, %v2355_v14  ;;  %v2419_v16 = vadd.f32 %v2418_v44, %v2404_v32  ;;  %v2366_v63 = vadd.f32 %v3298_v45, %v2983_v42  ;;  %v2387_v6 = vadd.f32 %v2983_v42, %v2386_v7 }
 0x4c1   : > { %v2357_v58 = vpop.f32.mrf.mxu0  ;;  %v3306_v18 = vpop.f32.mrf.mxu1  ;;  %v2415_v15 = vmul.f32 0.0, %v2395_v12 }
 0x4c2   : > { %v2420_v5 = vadd.f32 %v2419_v16, %v2405_v10  ;;  %v2358_v21 = vadd.f32 %v2983_v42, %v2357_v58  ;;  %v2408_v0 = vmul.f32 0.0, %v2366_v63  ;;  %v2413_v52 = vmul.f32 0.0, %v2387_v6 }
 0x4c3   : > { %v2389_v61 = vpop.f32.mrf.mxu1  ;;  %v2398_v62 = vadd.f32 %v3306_v18, %v2983_v42 }
 0x4c4   : > { %v2406_v25 = vmul.f32 0.0, %v2358_v21  ;;  %v2390_v24 = vadd.f32 %v2983_v42, %v2389_v61 }
 0x4c5   : > { %v2416_v26 = vmul.f32 0.0, %v2398_v62 }
 0x4c6   : > { %v2421_v2 = vadd.f32 %v2420_v5, %v2406_v25  ;;  %v2414_v47 = vmul.f32 0.0, %v2390_v24 }
 0x4c8   : > { %v2422_v30 = vadd.f32 %v2421_v2, %v2407_v4 }
 0x4ca   : > { %v2423_v23 = vadd.f32 %v2422_v30, %v2408_v0 }
 0x4cc   : > { %v2424_v8 = vadd.f32 %v2423_v23, %v2409_v13 }
 0x4ce   : > { %v2425_v3 = vadd.f32 %v2424_v8, %v2410_v9 }
 0x4d0   : > { %v2426_v34 = vadd.f32 %v2425_v3, %v2411_v56 }
 0x4d2   : > { %v2427_v11 = vadd.f32 %v2426_v34, %v2412_v19 }
 0x4d4   : > { %v2428_v57 = vadd.f32 %v2427_v11, %v2413_v52 }
 0x4d6   : > { %v2429_v27 = vadd.f32 %v2428_v57, %v2414_v47 }
 0x4d8   : > { %v2430_v28 = vadd.f32 %v2429_v27, %v2415_v15 }
 0x4da   : > { %v2431_v36 = vadd.f32 %v2430_v28, %v2416_v26 }
 0x4dc   : > { %v2432_v31 = vrot.slane %v2431_v36, 4 }
 0x4de   : > { %v2433_v51 = vadd.f32 %v2432_v31, %v2431_v36 }
 0x4e0   : > { %v2434_v35 = vrot.slane %v2433_v51, 2 }
 0x4e2   : > { %v2435_v41 = vadd.f32 %v2434_v35, %v2433_v51 }
 0x4e4   : > { %v2436_v38 = vrot.slane %v2435_v41, 1 }
 0x4e6   : > { %v2437_v48 = vadd.f32 %v2436_v38, %v2435_v41 }
 0x4e8   : > { %v2438_v37 = vmul.f32 0.125, %v2437_v48 }
 0x4ea   : > { %v4447_v49 = vsub.f32 %v2342_v1, %v2438_v37  ;;  %v4450_v59 = vsub.f32 %v4438_v33, %v2438_v37  ;;  %v4455_v53 = vsub.f32 %v4440_v54, %v2438_v37  ;;  %v4458_v39 = vsub.f32 %v4442_v29, %v2438_v37 }
 0x4eb   : > { %v4460_v46 = vsub.f32 %v2355_v14, %v2438_v37  ;;  %v4464_v1 = vsub.f32 %v2358_v21, %v2438_v37  ;;  %v4470_v44 = vsub.f32 %v2363_v40, %v2438_v37  ;;  %v4474_v45 = vsub.f32 %v2366_v63, %v2438_v37 }
 0x4ec   : > { %v2456_v42 = vmul.f32 %v4447_v49, %v4447_v49  ;;  %v2457_v55 = vmul.f32 %v4450_v59, %v4450_v59  ;;  %v2455_v33 = vmul.f32 %v4455_v53, %v4455_v53  ;;  %v2458_v32 = vmul.f32 %v4458_v39, %v4458_v39 }
 0x4ed   : > { %v2459_v54 = vmul.f32 %v4460_v46, %v4460_v46  ;;  %v2460_v10 = vmul.f32 %v4464_v1, %v4464_v1  ;;  %v2447_v58 = vsub.f32 %v2371_v22, %v2438_v37  ;;  %v2461_v5 = vmul.f32 %v4470_v44, %v4470_v44 }
 0x4ee   : > { %v2472_v43 = vmul.f32 0.0, %v2456_v42  ;;  %v2473_v29 = vmul.f32 0.0, %v2457_v55  ;;  %v2474_v16 = vmul.f32 0.0, %v2458_v32  ;;  %v2448_v40 = vsub.f32 %v2374_v60, %v2438_v37 }
 0x4ef   : > { %v2475_v21 = vmul.f32 0.0, %v2459_v54  ;;  %v2462_v7 = vmul.f32 %v4474_v45, %v4474_v45  ;;  %v2476_v4 = vmul.f32 0.0, %v2460_v10  ;;  %v2449_v0 = vsub.f32 %v2379_v20, %v2438_v37 }
 0x4f0   : > { %v2487_v14 = vadd.f32 %v2472_v43, %v2455_v33  ;;  %v2463_v63 = vmul.f32 %v2447_v58, %v2447_v58  ;;  %v2477_v30 = vmul.f32 0.0, %v2461_v5  ;;  %v2450_v13 = vsub.f32 %v2382_v50, %v2438_v37 }
 0x4f1   : > { %v2464_v23 = vmul.f32 %v2448_v40, %v2448_v40  ;;  %v2478_v9 = vmul.f32 0.0, %v2462_v7  ;;  %v2451_v22 = vsub.f32 %v2387_v6, %v2438_v37  ;;  %v2465_v61 = vmul.f32 %v2449_v0, %v2449_v0 }
 0x4f2   : > { %v2488_v17 = vadd.f32 %v2487_v14, %v2473_v29  ;;  %v2479_v56 = vmul.f32 0.0, %v2463_v63  ;;  %v2452_v19 = vsub.f32 %v2390_v24, %v2438_v37  ;;  %v2466_v34 = vmul.f32 %v2450_v13, %v2450_v13 }
 0x4f3   : > { %v2480_v60 = vmul.f32 0.0, %v2464_v23  ;;  %v2453_v11 = vsub.f32 %v2395_v12, %v2438_v37  ;;  %v2467_v47 = vmul.f32 %v2451_v22, %v2451_v22  ;;  %v2481_v57 = vmul.f32 0.0, %v2465_v61 }
 0x4f4   : > { %v2489_v25 = vadd.f32 %v2488_v17, %v2474_v16  ;;  %v2454_v20 = vsub.f32 %v2398_v62, %v2438_v37  ;;  %v2468_v27 = vmul.f32 %v2452_v19, %v2452_v19  ;;  %v2482_v26 = vmul.f32 0.0, %v2466_v34 }
 0x4f5   : > { %v2469_v50 = vmul.f32 %v2453_v11, %v2453_v11  ;;  %v2483_v36 = vmul.f32 0.0, %v2467_v47 }
 0x4f6   : > { %v2490_v2 = vadd.f32 %v2489_v25, %v2475_v21  ;;  %v2470_v51 = vmul.f32 %v2454_v20, %v2454_v20  ;;  %v2484_v6 = vmul.f32 0.0, %v2468_v27 }
 0x4f7   : > { %v2485_v41 = vmul.f32 0.0, %v2469_v50 }
 0x4f8   : > { %v2491_v18 = vadd.f32 %v2490_v2, %v2476_v4  ;;  %v2486_v24 = vmul.f32 0.0, %v2470_v51  ;;  %v2992_v4 = vld [vmem:[%s773_s23] ss:$0 sm:$0xff] }
 0x4fa   : > { %v2492_v8 = vadd.f32 %v2491_v18, %v2477_v30 }
 0x4fc   : > { %v2493_v3 = vadd.f32 %v2492_v8, %v2478_v9 }
 0x4fe   : > { %v2494_v52 = vadd.f32 %v2493_v3, %v2479_v56 }
 0x500   : > { %v2495_v15 = vadd.f32 %v2494_v52, %v2480_v60 }
 0x502   : > { %v2496_v28 = vadd.f32 %v2495_v15, %v2481_v57 }
 0x504   : > { %v2497_v31 = vadd.f32 %v2496_v28, %v2482_v26 }
 0x506   : > { %v2498_v35 = vadd.f32 %v2497_v31, %v2483_v36 }
 0x508   : > { %v2499_v38 = vadd.f32 %v2498_v35, %v2484_v6 }
 0x50a   : > { %v2500_v48 = vadd.f32 %v2499_v38, %v2485_v41 }
 0x50c   : > { %v2501_v42 = vadd.f32 %v2500_v48, %v2486_v24 }
 0x50e   : > { %v2502_v55 = vrot.slane %v2501_v42, 4 }
 0x510   : > { %v2503_v12 = vadd.f32 %v2502_v55, %v2501_v42 }
 0x512   : > { %v2504_v43 = vrot.slane %v2503_v12, 2 }
 0x514   : > { %v2505_v33 = vadd.f32 %v2504_v43, %v2503_v12 }
 0x516   : > { %v2506_v62 = vrot.slane %v2505_v33, 1 }
 0x518   : > { %v2507_v37 = vadd.f32 %v2506_v62, %v2505_v33 }
 0x51a   : > { %v2508_v32 = vmul.f32 0.125, %v2507_v37 }
 0x51c   : > { %v2509_v54 = vadd.f32 1e-05, %v2508_v32 }
 0x51e   : > { %3501 = vrsqrt.f32 %v2509_v54 }
 0x52b   : > { %v3502_v29 = vpop.eup %3501 }
 0x52c   : > { %v2511_v14 = vmul.f32 %v3502_v29, %v4455_v53  ;;  %v2512_v10 = vmul.f32 %v3502_v29, %v4447_v49  ;;  %v2513_v16 = vmul.f32 %v3502_v29, %v4450_v59  ;;  %v2514_v17 = vmul.f32 %v3502_v29, %v4458_v39 }
 0x52d   : > { %v2515_v5 = vmul.f32 %v3502_v29, %v4460_v46  ;;  %v2516_v21 = vmul.f32 %v3502_v29, %v4464_v1  ;;  %v2517_v25 = vmul.f32 %v3502_v29, %v4470_v44  ;;  %v2518_v7 = vmul.f32 %v3502_v29, %v4474_v45 }
 0x52e   : > { %v2519_v53 = vmul.f32 %v3502_v29, %v2447_v58  ;;  %v2520_v49 = vmul.f32 %v3502_v29, %v2448_v40  ;;  %v2521_v2 = vmul.f32 %v3502_v29, %v2449_v0  ;;  %v2522_v59 = vmul.f32 %v3502_v29, %v2450_v13  ;;  %v2993_v58 = vld [vmem:[%s776_s17] ss:$0 sm:$0xff] }
 0x52f   : > { %v2523_v63 = vmul.f32 %v3502_v29, %v2451_v22  ;;  %v2524_v39 = vmul.f32 %v3502_v29, %v2452_v19  ;;  %v2525_v30 = vmul.f32 %v3502_v29, %v2453_v11  ;;  %v2526_v46 = vmul.f32 %v3502_v29, %v2454_v20 }
 0x530   : > { %v2534_v18 = vmul.f32 %v2992_v4, %v2511_v14  ;;  %v2535_v1 = vmul.f32 %v2992_v4, %v2512_v10  ;;  %v2536_v23 = vmul.f32 %v2992_v4, %v2513_v16  ;;  %v2537_v44 = vmul.f32 %v2992_v4, %v2514_v17 }
 0x531   : > { %v2538_v9 = vmul.f32 %v2992_v4, %v2515_v5  ;;  %v2539_v45 = vmul.f32 %v2992_v4, %v2516_v21  ;;  %v2540_v8 = vmul.f32 %v2992_v4, %v2517_v25  ;;  %v2541_v61 = vmul.f32 %v2992_v4, %v2518_v7 }
 0x532   : > { %v2542_v40 = vmul.f32 %v2992_v4, %v2519_v53  ;;  %v2543_v0 = vmul.f32 %v2992_v4, %v2520_v49  ;;  %v2544_v13 = vmul.f32 %v2992_v4, %v2521_v2  ;;  %v2545_v22 = vmul.f32 %v2992_v4, %v2522_v59 }
 0x533   : > { %v2546_v56 = vmul.f32 %v2992_v4, %v2523_v63  ;;  %v2547_v3 = vmul.f32 %v2992_v4, %v2524_v39  ;;  %v2548_v19 = vmul.f32 %v2992_v4, %v2525_v30  ;;  %v2549_v34 = vmul.f32 %v2992_v4, %v2526_v46 }
 0x534   : > { %v4500_v60 = vadd.f32 %v2993_v58, %v2534_v18  ;;  %v2558_v52 = vadd.f32 %v2993_v58, %v2535_v1  ;;  %v2559_v11 = vadd.f32 %v2993_v58, %v2536_v23  ;;  %v2560_v47 = vadd.f32 %v2993_v58, %v2537_v44 }
 0x535   : > { %v2561_v57 = vadd.f32 %v2993_v58, %v2538_v9  ;;  %v2562_v15 = vadd.f32 %v2993_v58, %v2539_v45  ;;  %v2563_v20 = vadd.f32 %v2993_v58, %v2540_v8  ;;  %v2564_v27 = vadd.f32 %v2993_v58, %v2541_v61 }
 0x536   : > { %v2565_v26 = vadd.f32 %v2993_v58, %v2542_v40  ;;  %v2566_v28 = vadd.f32 %v2993_v58, %v2543_v0  ;;  %v2567_v50 = vadd.f32 %v2993_v58, %v2544_v13  ;;  %v2568_v36 = vadd.f32 %v2993_v58, %v2545_v22 }
 0x537   : > { %v2569_v31 = vadd.f32 %v2993_v58, %v2546_v56  ;;  %v2570_v51 = vadd.f32 %v2993_v58, %v2547_v3  ;;  %v2571_v6 = vadd.f32 %v2993_v58, %v2548_v19  ;;  %v2572_v35 = vadd.f32 %v2993_v58, %v2549_v34  ;;  %2592 = sbr.rel (%p2994_p4) target bundleno = 1350 (0x546), region = 124 }
 0x538   : > { %v4502_v41 = vmul.f32 0.0, %v2558_v52  ;;  %v4504_v38 = vmul.f32 0.0, %v2559_v11  ;;  %v4506_v24 = vmul.f32 0.0, %v2560_v47  ;;  %v4508_v48 = vmul.f32 0.0, %v2561_v57 }
 0x539   : > { %v4510_v42 = vmul.f32 0.0, %v2562_v15  ;;  %v4512_v55 = vmul.f32 0.0, %v2563_v20  ;;  %v4514_v12 = vmul.f32 0.0, %v2564_v27  ;;  %v4516_v43 = vmul.f32 0.0, %v2565_v26 }
 0x53a   : > { %v4518_v33 = vmul.f32 0.0, %v2566_v28  ;;  %v4520_v62 = vmul.f32 0.0, %v2567_v50  ;;  %v4522_v37 = vmul.f32 0.0, %v2568_v36  ;;  %v4524_v32 = vmul.f32 0.0, %v2569_v31 }
 0x53b   : > { %v4526_v54 = vmul.f32 0.0, %v2570_v51  ;;  %v4528_v29 = vmul.f32 0.0, %v2571_v6  ;;  %v4530_v14 = vmul.f32 0.0, %v2572_v35 }
 0x53c   : > { %v2593_v10 = vmax.f32 %v4500_v60, 0.0  ;;  %v2594_v16 = vmax.f32 %v4502_v41, 0.0  ;;  %v2595_v17 = vmax.f32 %v4504_v38, 0.0  ;;  %v2596_v5 = vmax.f32 %v4506_v24, 0.0 }
 0x53d   : > { %v2597_v21 = vmax.f32 %v4508_v48, 0.0  ;;  %v2598_v25 = vmax.f32 %v4510_v42, 0.0  ;;  %v2599_v7 = vmax.f32 %v4512_v55, 0.0  ;;  %v2600_v4 = vmax.f32 %v4514_v12, 0.0 }
 0x53e   : > { %2609 = vst [vmem:[#allocation2 + $0x30] sm:$0xff] %v2593_v10  ;;  %2610 = vst [vmem:[#allocation2] sm:$0xff] %v2594_v16  ;;  %v2601_v53 = vmax.f32 %v4516_v43, 0.0  ;;  %v2602_v49 = vmax.f32 %v4518_v33, 0.0  ;;  %v2603_v2 = vmax.f32 %v4520_v62, 0.0  ;;  %v2604_v59 = vmax.f32 %v4522_v37, 0.0 }
 0x53f   : > { %2611 = vst [vmem:[#allocation2 + $0x58] sm:$0xff] %v2595_v17  ;;  %2612 = vst [vmem:[#allocation2 + $0x18] sm:$0xff] %v2596_v5  ;;  %v2605_v63 = vmax.f32 %v4524_v32, 0.0  ;;  %v2606_v39 = vmax.f32 %v4526_v54, 0.0  ;;  %v2607_v30 = vmax.f32 %v4528_v29, 0.0  ;;  %v2608_v46 = vmax.f32 %v4530_v14, 0.0 }
 0x540   : > { %2613 = vst [vmem:[#allocation2 + $0x50] sm:$0xff] %v2597_v21  ;;  %2614 = vst [vmem:[#allocation2 + $0x68] sm:$0xff] %v2598_v25 }
 0x541   : > { %2615 = vst [vmem:[#allocation2 + $0x8] sm:$0xff] %v2599_v7  ;;  %2616 = vst [vmem:[#allocation2 + $0x48] sm:$0xff] %v2600_v4 }
 0x542   : > { %2617 = vst [vmem:[#allocation2 + $0x40] sm:$0xff] %v2601_v53  ;;  %2618 = vst [vmem:[#allocation2 + $0x20] sm:$0xff] %v2602_v49 }
 0x543   : > { %2619 = vst [vmem:[#allocation2 + $0x10] sm:$0xff] %v2603_v2  ;;  %2620 = vst [vmem:[#allocation2 + $0x38] sm:$0xff] %v2604_v59 }
 0x544   : > { %2621 = vst [vmem:[#allocation2 + $0x60] sm:$0xff] %v2605_v63  ;;  %2622 = vst [vmem:[#allocation2 + $0x70] sm:$0xff] %v2606_v39 }
 0x545   : > { %2623 = vst [vmem:[#allocation2 + $0x78] sm:$0xff] %v2607_v30  ;;  %2624 = vst [vmem:[#allocation2 + $0x28] sm:$0xff] %v2608_v46 }
 0x546 PF: > { %p2995_p11 = scmp.ne.s32.totalorder %s3762_s21, 1 }
 0x548   : > { %2628 = sbr.rel (%p2995_p11) target bundleno = 1373 (0x55d), region = 128 }
 0x54d   : > { %2629 = vst [vmem:[#allocation2 + $0x30] sm:$0xff] %v4500_v60  ;;  %2630 = vst [vmem:[#allocation2] sm:$0xff] %v4502_v41 }
 0x54e   : > { %2631 = vst [vmem:[#allocation2 + $0x58] sm:$0xff] %v4504_v38  ;;  %2632 = vst [vmem:[#allocation2 + $0x18] sm:$0xff] %v4506_v24 }
 0x54f   : > { %2633 = vst [vmem:[#allocation2 + $0x50] sm:$0xff] %v4508_v48  ;;  %2634 = vst [vmem:[#allocation2 + $0x68] sm:$0xff] %v4510_v42 }
 0x550   : > { %2635 = vst [vmem:[#allocation2 + $0x8] sm:$0xff] %v4512_v55  ;;  %2636 = vst [vmem:[#allocation2 + $0x48] sm:$0xff] %v4514_v12 }
 0x551   : > { %2637 = vst [vmem:[#allocation2 + $0x40] sm:$0xff] %v4516_v43  ;;  %2638 = vst [vmem:[#allocation2 + $0x20] sm:$0xff] %v4518_v33 }
 0x552   : > { %2639 = vst [vmem:[#allocation2 + $0x10] sm:$0xff] %v4520_v62  ;;  %2640 = vst [vmem:[#allocation2 + $0x38] sm:$0xff] %v4522_v37 }
 0x553   : > { %2641 = vst [vmem:[#allocation2 + $0x60] sm:$0xff] %v4524_v32  ;;  %2642 = vst [vmem:[#allocation2 + $0x70] sm:$0xff] %v4526_v54 }
 0x554   : > { %2643 = vst [vmem:[#allocation2 + $0x78] sm:$0xff] %v4528_v29  ;;  %2644 = vst [vmem:[#allocation2 + $0x28] sm:$0xff] %v4530_v14 }
 0x555   : > { %2645 = vst [vmem:[#allocation18] sm:$0xff] %v4500_v60  ;;  %2646 = vst [vmem:[#allocation18 + $0x8] sm:$0xff] %v4502_v41 }
 0x556   : > { %2647 = vst [vmem:[#allocation18 + $0x10] sm:$0xff] %v4504_v38  ;;  %2648 = vst [vmem:[#allocation18 + $0x18] sm:$0xff] %v4506_v24 }
 0x557   : > { %2649 = vst [vmem:[#allocation18 + $0x20] sm:$0xff] %v4508_v48  ;;  %2650 = vst [vmem:[#allocation18 + $0x28] sm:$0xff] %v4510_v42 }
 0x558   : > { %2651 = vst [vmem:[#allocation18 + $0x30] sm:$0xff] %v4512_v55  ;;  %2652 = vst [vmem:[#allocation18 + $0x38] sm:$0xff] %v4514_v12 }
 0x559   : > { %2653 = vst [vmem:[#allocation18 + $0x40] sm:$0xff] %v4516_v43  ;;  %2654 = vst [vmem:[#allocation18 + $0x48] sm:$0xff] %v4518_v33 }
 0x55a   : > { %2655 = vst [vmem:[#allocation18 + $0x50] sm:$0xff] %v4520_v62  ;;  %2656 = vst [vmem:[#allocation18 + $0x58] sm:$0xff] %v4522_v37 }
 0x55b   : > { %2657 = vst [vmem:[#allocation18 + $0x60] sm:$0xff] %v4524_v32  ;;  %2658 = vst [vmem:[#allocation18 + $0x68] sm:$0xff] %v4526_v54 }
 0x55c   : > { %2659 = vst [vmem:[#allocation18 + $0x70] sm:$0xff] %v4528_v29  ;;  %2660 = vst [vmem:[#allocation18 + $0x78] sm:$0xff] %v4530_v14 }
 0x55d PF: > { %p3381_p1 = scmp.eq.s32.totalorder %s3894_s24, 1  ;;  %s3782_s21 = smov [#allocation18]  }
 0x55e   : > { %s2667_s6 = sshll.u32 %s3782_s21, 4  ;;  %s2668_s6 = int_to_ptr.vmem [resolvable:$true] %s2667_s6 }
 0x55f   : > { %s3676_s17 = scalar_lea.vmem %s2668_s6, 2048  ;;  %p3683_p0 = scmp.lt.s32.totalorder %s2668_s6, %s2668_s6 }
 0x560   : > { %p3677_p8 = scmp.ne.s32.totalorder %s2668_s6, %s3676_s17  ;;  %p3684_p3 = scmp.lt.s32.totalorder %s3676_s17, %s3676_s17 }
 0x562   : > { %p3678_p12 = pnand %p3677_p8, %p3381_p1  ;;  %p3685_p7 = por %p3684_p3, %p3683_p0 }
 0x564   : > { %p3679_p2 = pneg %p3678_p12 }
 0x566   : > { %p3686_p9 = pnand %p3685_p7, %p3679_p2 }
 0x568   : > { %3689 = shalt.err (!%p3686_p9)
}
 0x569   : > { %s3783_s2 = smov 128   ;;  %s3784_s12 = smov 8  }
 0x56a   : > { %s4705_s29 = sld [smem:[#allocation47_spill]] }
 0x570   : > { %3346 = dma.vmem_to_hbm [thread:$0]  (%p3381_p1), %s2668_s6, 2048, %s4705_s29, [#allocation7], %s3783_s2, %s3783_s2, %s3784_s12  }
 0x571   : > { %3745 = dma.done.wait (%p3381_p1), [#allocation7], 2048  }
 0x572   : > { %3747 = vsyncadd (%p3381_p1), [#allocation7], 4294965248 }
 0x573 PF: > { %s4706_s4 = sld [smem:[#allocation26_spill]]  ;;  %s4710_s18 = smov %s3754_s19 }
 0x574   : > { %s4707_s3 = sld [smem:[#allocation28_spill]]  ;;  %s4711_s19 = smov %s3758_s20 }
 0x575   : > { %s4708_s21 = sld [smem:[#allocation25_spill]] }
 0x576   : > { %s4709_s22 = sld [smem:[#allocation27_spill]] }
 0x579   : > { %s35_s23 = sadd.s32 1, %s4706_s4  }
 0x57a   : > { %p32_p6 = scmp.ge.s32.totalorder %s35_s23, 4   ;;  %s4712_s20 = smov %s4707_s3 }
 0x57c   :  { %34 = sbr.rel (!%p32_p6) target bundleno = 24 (0x18), region = 203 }
 0x581   :  { %2683 = vsyncpa [#allocation6], 1 }
 0x582   :  { %2685 = vsyncpa [#allocation6 + $0x1], 1 }
 0x583   :  { %2686 = vsyncpa [#allocation10], 1 }
 0x584   :  { %2687 = vsyncpa [#allocation14], 1 }
 0x585   :  { %2689 = vsyncpa [#allocation14 + $0x1], 1 }
 0x586   :  { %2690 = vsyncpa [#allocation17], 1 }
 0x587   :  { %2692 = vsyncpa [#allocation17 + $0x1], 1 }
 0x588   :  { %2693 = vsyncpa [#allocation7], 1 }
 0x589   :  { %2695 = vsyncpa [#allocation7 + $0x1], 1 }
 0x58a   :  { %2696 = vsyncpa [#allocation8], 1 }
 0x58b   :  { %2698 = vsyncpa [#allocation8 + $0x1], 1 }

</bundles_post_ra>
